<compile_context>
chip_gen: v7x
topology: tpu7x:2x2x1
jax: 0.10.0
libtpu: 0.0.40
codegen_flags: <defaults>
</compile_context>

<pallas_src>
import functools

import jax
import jax.numpy as jnp
import numpy as np
from jax import lax
from jax.experimental import pallas as pl
from jax.experimental.pallas import tpu as pltpu

# The PyTorch reference's parallel_scan re-initializes the SSM state at the
# start of every 256-step chunk; the kernel reproduces exactly that schedule.
REF_CHUNK = 256


def _mamba_kernel(x_ref, w_in_hbm, w_out_hbm, w_x_ref, w_dt_ref,
                  b_in_ref, conv_w_ref, conv_b_ref, b_dt_ref, a_t_ref, b_out_ref,
                  o_ref,
                  w_in_vmem, w_out_vmem, dma_sem,
                  dlt_scr, du_scr, bct_scr, y_scr, state_scr, conv_scr,
                  *, Lc, d_inner, n_state, K, SB, DSLAB, P, exp_dtype):
    chunk = pl.program_id(1)
    f32 = jnp.float32

    # ---- stage the two big projection weights into VMEM (1x footprint) -----
    # Guarded on chunk==0 (not batch==0) so it is megacore-safe: each core
    # re-stages at the first chunk of every batch element it owns.
    @pl.when(chunk == 0)
    def _():
        cp_in = pltpu.make_async_copy(w_in_hbm, w_in_vmem, dma_sem.at[0])
        cp_out = pltpu.make_async_copy(w_out_hbm, w_out_vmem, dma_sem.at[1])
        cp_in.start()
        cp_out.start()
        cp_in.wait()
        cp_out.wait()
        if K > 1:
            # causal-conv tail (first K-1 rows of conv_scr) reset at seq start
            conv_scr[0:K - 1, :] = jnp.zeros((K - 1, d_inner), f32)

    # SSM state resets every REF_CHUNK timesteps (reference semantics); with
    # Lc <= REF_CHUNK and L % REF_CHUNK == 0 this also covers chunk == 0.
    start_pos = chunk * Lc

    @pl.when(start_pos % REF_CHUNK == 0)
    def _():
        state_scr[...] = jnp.zeros_like(state_scr)

    mm = w_in_vmem.dtype                                         # matmul dtype (bf16)

    # ---- in_proj (MXU, bf16 inputs, f32 accumulate) ------------------------
    x = x_ref[0]                                                 # (Lc, d_model) bf16
    xr = jnp.dot(x, w_in_vmem[...],
                 preferred_element_type=f32) + b_in_ref[...]     # (Lc, 2*d_inner)
    xi = xr[:, :d_inner]
    res = xr[:, d_inner:]

    # ---- causal depthwise conv1d via shifted window reads of a scratch -----
    if K > 1:
        conv_scr[K - 1:K - 1 + Lc, :] = xi
        acc = conv_scr[0:Lc, :] * conv_w_ref[0:1, :]
        for k in range(1, K):                                    # K static
            acc = acc + conv_scr[k:k + Lc, :] * conv_w_ref[k:k + 1, :]
        # carry the last K-1 input rows to the front for the next chunk
        conv_scr[0:K - 1, :] = conv_scr[Lc:Lc + K - 1, :]
    else:
        acc = xi * conv_w_ref[0:1, :]
    xc = acc + conv_b_ref[...]
    xs = xc * jax.nn.sigmoid(xc)                                 # SiLU, f32

    # ---- merged x_proj (delta-low padded to P=128 | B | C), then dt_proj ---
    xs_mm = xs.astype(mm)
    xpr = jnp.dot(xs_mm, w_x_ref[...], preferred_element_type=f32)   # (Lc, P+2n)
    delta = jax.nn.softplus(
        jnp.dot(xpr[:, :P].astype(mm), w_dt_ref[...],
                preferred_element_type=f32) + b_dt_ref[...])     # (Lc, d_inner)
    bc = xpr[:, P:]                                              # (Lc, 2*n_state)

    # Scan operands stored lane-dense (d_inner on lanes) once per chunk.
    dlt_scr[...] = delta
    du_scr[...] = delta * xs

    # [B|C] transposed once per SB-block -> (n_state, 1) sublane columns in the
    # scan (replaces the per-timestep eye-mask + XLU lane reduces).
    nb = Lc // SB
    for blk in range(nb):                                        # static loop, 2D transposes
        bct_scr[blk] = bc[blk * SB:(blk + 1) * SB, :].T          # (2n, SB)

    # ---- selective scan: sequential over time, slab-tiled over d_inner -----
    n_slab = d_inner // DSLAB
    for s in range(n_slab):                                      # static slab loop
        d0 = s * DSLAB
        a_sl = a_t_ref[:, pl.ds(d0, DSLAB)]                      # (n, DSLAB) = -exp(A_log)

        def block_body(i, state):
            base = pl.multiple_of(i * SB, SB)
            d_blk = dlt_scr[pl.ds(base, SB), pl.ds(d0, DSLAB)]   # (SB, DSLAB)
            du_blk = du_scr[pl.ds(base, SB), pl.ds(d0, DSLAB)]   # (SB, DSLAB)
            bct = bct_scr[i]                                     # (2n, SB)
            rows = []
            for j in range(SB):                                  # static unroll
                # dA computed on the fly (EUP exp + VPU muls), never stored.
                z = d_blk[j:j + 1, :] * a_sl                     # (n, DSLAB)
                dA = jnp.exp(z.astype(exp_dtype)).astype(f32)
                b_col = bct[0:n_state, j:j + 1]                  # (n, 1)
                c_col = bct[n_state:, j:j + 1]                   # (n, 1)
                state = dA * state + b_col * du_blk[j:j + 1, :]
                rows.append(jnp.sum(state * c_col, axis=0, keepdims=True))
            y_scr[pl.ds(base, SB), pl.ds(d0, DSLAB)] = jnp.concatenate(rows, axis=0)
            return state

        st = lax.fori_loop(0, nb, block_body, state_scr[:, pl.ds(d0, DSLAB)])
        state_scr[:, pl.ds(d0, DSLAB)] = st                      # spill once per chunk

    # ---- gate with SiLU(res), out_proj -------------------------------------
    y = y_scr[...] * (res * jax.nn.sigmoid(res))
    out = jnp.dot(y.astype(mm), w_out_vmem[...],
                  preferred_element_type=f32) + b_out_ref[...]
    o_ref[0] = out.astype(o_ref.dtype)
    # NOTE: the reference forward never uses self.D (no skip term), so neither do we.


def parallel_mamba_pallas(x, params, *, d_inner, n_state, dt_rank, K,
                          matmul_dtype=jnp.bfloat16,
                          scan_exp_dtype=jnp.float32):
    """Mamba block forward.  On v6e/v7x, pass scan_exp_dtype=jnp.bfloat16 to
    double EUP exp throughput (slightly looser numerics)."""
    B, L, d_model = x.shape
    f32 = jnp.float32

    # L-chunking: one grid step per (batch, chunk).  The reference resets its
    # SSM state every REF_CHUNK steps, so chunks never need to exceed that.
    if L <= REF_CHUNK:
        Lc = L
    else:
        assert L % REF_CHUNK == 0, (
            "TODO(synk): pad L to a multiple of 256 for arbitrary lengths")
        Lc = REF_CHUNK
    nc = L // Lc
    SB = 8 if Lc % 8 == 0 else 1          # timesteps per coalesced y store
    nb = Lc // SB

    # d_inner lane-slab width for the scan: keeps the live state+dA slab small
    # enough for the 64-vreg file (no per-timestep spills at production sizes).
    DSLAB = d_inner
    if d_inner > 512:
        for cand in (512, 256, 128):
            if d_inner % cand == 0:
                DSLAB = cand
                break

    # delta-low width padded to a 128-lane boundary inside the merged x_proj.
    P = max(128, ((dt_rank + 127) // 128) * 128)

    # ---- weight / input prep (glue) ----------------------------------------
    x = x.astype(matmul_dtype)                                   # in_proj consumes bf16
    w_in = params['in_proj_w'].T.astype(matmul_dtype)            # (d_model, 2*d_inner)
    b_in = params['in_proj_b'][None, :].astype(f32)
    conv_w = jnp.transpose(params['conv_w'][:, 0, :]).astype(f32)  # (K, d_inner)
    conv_b = params['conv_b'][None, :].astype(f32)

    w_xp = params['x_proj_w']                                    # (dt_rank+2N, d_inner)
    w_xdt = jnp.zeros((d_inner, P), f32).at[:, :dt_rank].set(w_xp[:dt_rank].T)
    w_xbc = w_xp[dt_rank:].T.astype(f32)                         # (d_inner, 2*n_state)
    w_x = jnp.concatenate([w_xdt, w_xbc], axis=1).astype(matmul_dtype)  # (d_inner, P+2N)

    w_dt = jnp.zeros((P, d_inner), f32).at[:dt_rank, :].set(params['dt_proj_w'].T)
    w_dt = w_dt.astype(matmul_dtype)                             # (P, d_inner)
    b_dt = params['dt_proj_b'][None, :].astype(f32)

    a_t = (-jnp.exp(params['A_log'])).T.astype(f32)              # (n_state, d_inner), precomputed
    w_out = params['out_proj_w'].T.astype(matmul_dtype)          # (d_inner, d_model)
    b_out = params['out_proj_b'][None, :].astype(f32)

    kernel = functools.partial(_mamba_kernel, Lc=Lc, d_inner=d_inner,
                               n_state=n_state, K=K, SB=SB, DSLAB=DSLAB, P=P,
                               exp_dtype=scan_exp_dtype)

    def full(arr):
        return pl.BlockSpec(arr.shape, lambda b, c: (0,) * arr.ndim)

    scratch_shapes = [
        pltpu.VMEM(w_in.shape, w_in.dtype),          # staged in_proj weight (1x, not 2x)
        pltpu.VMEM(w_out.shape, w_out.dtype),        # staged out_proj weight
        pltpu.SemaphoreType.DMA((2,)),
        pltpu.VMEM((Lc, d_inner), f32),              # delta
        pltpu.VMEM((Lc, d_inner), f32),              # delta * u
        pltpu.VMEM((nb, 2 * n_state, SB), f32),      # [B|C] transposed per SB block
        pltpu.VMEM((Lc, d_inner), f32),              # y
        pltpu.VMEM((n_state, d_inner), f32),         # SSM state (carried across chunks)
        pltpu.VMEM((Lc + K - 1, d_inner), f32),      # conv window (+ carried tail)
    ]

    grid_spec = pltpu.PrefetchScalarGridSpec(
        num_scalar_prefetch=0,
        grid=(B, nc),
        in_specs=[
            pl.BlockSpec((1, Lc, d_model), lambda b, c: (b, c, 0)),
            pl.BlockSpec(memory_space=pl.ANY),       # w_in : staged manually
            pl.BlockSpec(memory_space=pl.ANY),       # w_out: staged manually
            full(w_x), full(w_dt),
            full(b_in), full(conv_w), full(conv_b), full(b_dt), full(a_t), full(b_out),
        ],
        out_specs=pl.BlockSpec((1, Lc, d_model), lambda b, c: (b, c, 0)),
        scratch_shapes=scratch_shapes,
    )

    # ---- scoped-VMEM budget from the actual tile math ----------------------
    mm_bytes = jnp.dtype(matmul_dtype).itemsize
    staged = (int(np.prod(w_in.shape)) + int(np.prod(w_out.shape))) * mm_bytes
    small = 2 * sum(int(np.prod(a.shape)) * a.dtype.itemsize
                    for a in (w_x, w_dt, b_in, conv_w, conv_b, b_dt, a_t, b_out))
    tiles = 2 * Lc * d_model * (mm_bytes + 4)        # double-buffered x (bf16) + out (f32)
    scratch = 4 * (3 * Lc * d_inner + n_state * d_inner + (Lc + K - 1) * d_inner
                   + nb * 2 * n_state * max(SB, 128))
    need = staged + small + tiles + scratch
    try:
        phys_vmem = int(pltpu.get_tpu_info().vmem_capacity_bytes)
    except Exception:
        phys_vmem = 64 << 20                          # conservative fallback (fits v7x)
    vmem_limit = max(32 << 20,
                     min(int(1.5 * need) + (16 << 20), int(0.85 * phys_vmem)))

    return pl.pallas_call(
        kernel,
        out_shape=jax.ShapeDtypeStruct((B, L, d_model), f32),
        grid_spec=grid_spec,
        compiler_params=pltpu.CompilerParams(
            dimension_semantics=("parallel", "arbitrary"),   # batch across v7x's 2 TCs
            vmem_limit_bytes=vmem_limit),
    )(x, w_in, w_out, w_x, w_dt, b_in, conv_w, conv_b, b_dt, a_t, b_out)


def parallel_mamba_ref(x, params, *, d_inner, n_state, dt_rank, K):
    """Pure-JAX f32 reference mirroring the PyTorch forward (incl. the
    256-step state reset of its parallel_scan)."""
    B, L, d_model = x.shape
    xr = x @ params['in_proj_w'].T + params['in_proj_b']
    xi, res = xr[..., :d_inner], xr[..., d_inner:]
    xp = jnp.pad(xi, ((0, 0), (K - 1, 0), (0, 0)))
    conv = sum(xp[:, k:k + L, :] * params['conv_w'][:, 0, k][None, None, :]
               for k in range(K)) + params['conv_b']
    xs = jax.nn.silu(conv)
    xproj = xs @ params['x_proj_w'].T
    dlt = xproj[..., :dt_rank]
    Bm = xproj[..., dt_rank:dt_rank + n_state]
    Cm = xproj[..., dt_rank + n_state:]
    delta = jax.nn.softplus(dlt @ params['dt_proj_w'].T + params['dt_proj_b'])
    A = -jnp.exp(params['A_log'])
    dA = jnp.exp(jnp.einsum('bld,dn->bldn', delta, A))
    dBu = jnp.einsum('bld,bln,bld->bldn', delta, Bm, xs)

    def scan_fn(state, t):
        state = jnp.where(t % REF_CHUNK == 0, jnp.zeros_like(state), state)
        state = dA[:, t] * state + dBu[:, t]
        y = jnp.einsum('bdn,bn->bd', state, Cm[:, t])
        return state, y

    state0 = jnp.zeros((B, d_inner, n_state), jnp.float32)
    _, ys = lax.scan(scan_fn, state0, jnp.arange(L))
    y = jnp.transpose(ys, (1, 0, 2))
    y = y * jax.nn.silu(res)
    return y @ params['out_proj_w'].T + params['out_proj_b']


if __name__ == "__main__":
    batch, seq_len = 2, 8
    d_model, d_inner, n_state, dt_rank, K = 16, 32, 8, 4, 3

    key = jax.random.PRNGKey(0)
    ks = jax.random.split(key, 12)
    f32 = jnp.float32
    params = {
        'A_log':      jax.random.normal(ks[0], (d_inner, n_state), f32),
        'D':          jax.random.normal(ks[1], (d_inner,), f32),  # unused in forward (as in reference)
        'in_proj_w':  0.1 * jax.random.normal(ks[2], (2 * d_inner, d_model), f32),
        'in_proj_b':  0.1 * jax.random.normal(ks[3], (2 * d_inner,), f32),
        'conv_w':     0.1 * jax.random.normal(ks[4], (d_inner, 1, K), f32),
        'conv_b':     0.1 * jax.random.normal(ks[5], (d_inner,), f32),
        'x_proj_w':   0.1 * jax.random.normal(ks[6], (dt_rank + 2 * n_state, d_inner), f32),
        'dt_proj_w':  0.1 * jax.random.normal(ks[7], (d_inner, dt_rank), f32),
        'dt_proj_b':  0.1 * jax.random.normal(ks[8], (d_inner,), f32),
        'out_proj_w': 0.1 * jax.random.normal(ks[9], (d_model, d_inner), f32),
        'out_proj_b': 0.1 * jax.random.normal(ks[10], (d_model,), f32),
    }
    x = jax.random.normal(ks[11], (batch, seq_len, d_model), f32)

    out = parallel_mamba_pallas(x, params, d_inner=d_inner, n_state=n_state,
                                dt_rank=dt_rank, K=K)
    out = jax.block_until_ready(out)

    ref = parallel_mamba_ref(x, params, d_inner=d_inner, n_state=n_state,
                             dt_rank=dt_rank, K=K)
    # bf16 MXU inputs (f32 accumulation) -> slightly looser tolerance than pure f32.
    np.testing.assert_allclose(np.asarray(out), np.asarray(ref), rtol=2e-2, atol=5e-3)

    print("KERNEL_OK")
</pallas_src>

<mosaic_0001>
module attributes {stable_mosaic.version = 11 : i64} {
  func.func @_mamba_kernel(%arg0: i32, %arg1: i32, %arg2: memref<1x8x16xbf16, #tpu.memory_space<vmem>>, %arg3: memref<16x64xbf16, #tpu.memory_space<any>>, %arg4: memref<32x16xbf16, #tpu.memory_space<any>>, %arg5: memref<32x144xbf16, #tpu.memory_space<vmem>>, %arg6: memref<128x32xbf16, #tpu.memory_space<vmem>>, %arg7: memref<1x64xf32, #tpu.memory_space<vmem>>, %arg8: memref<3x32xf32, #tpu.memory_space<vmem>>, %arg9: memref<1x32xf32, #tpu.memory_space<vmem>>, %arg10: memref<1x32xf32, #tpu.memory_space<vmem>>, %arg11: memref<8x32xf32, #tpu.memory_space<vmem>>, %arg12: memref<1x16xf32, #tpu.memory_space<vmem>>, %arg13: memref<1x8x16xf32, #tpu.memory_space<vmem>>, %arg14: memref<16x64xbf16, #tpu.memory_space<vmem>>, %arg15: memref<32x16xbf16, #tpu.memory_space<vmem>>, %arg16: memref<2x!tpu.dma_semaphore, #tpu.memory_space<semaphore_mem>>, %arg17: memref<8x32xf32, #tpu.memory_space<vmem>>, %arg18: memref<8x32xf32, #tpu.memory_space<vmem>>, %arg19: memref<1x16x8xf32, #tpu.memory_space<vmem>>, %arg20: memref<8x32xf32, #tpu.memory_space<vmem>>, %arg21: memref<8x32xf32, #tpu.memory_space<vmem>>, %arg22: memref<10x32xf32, #tpu.memory_space<vmem>>) attributes {dimension_semantics = [#tpu.dimension_semantics<parallel>, #tpu.dimension_semantics<arbitrary>], iteration_bounds = array<i64: 2, 1>, scalar_prefetch = 0 : i64, scratch_operands = 9 : i64, tpu.core_type = #tpu.core_type<tc>, window_params = [{transform_indices = @transform_0, window_bounds = array<i64: 1, 8, 16>}, {}, {}, {pipeline_mode = #tpu.pipeline_mode<synchronous>, transform_indices = @transform_3, window_bounds = array<i64: 32, 144>}, {pipeline_mode = #tpu.pipeline_mode<synchronous>, transform_indices = @transform_4, window_bounds = array<i64: 128, 32>}, {pipeline_mode = #tpu.pipeline_mode<synchronous>, transform_indices = @transform_5, window_bounds = array<i64: 1, 64>}, {pipeline_mode = #tpu.pipeline_mode<synchronous>, transform_indices = @transform_6, window_bounds = array<i64: 3, 32>}, {pipeline_mode = #tpu.pipeline_mode<synchronous>, transform_indices = @transform_7, window_bounds = array<i64: 1, 32>}, {pipeline_mode = #tpu.pipeline_mode<synchronous>, transform_indices = @transform_8, window_bounds = array<i64: 1, 32>}, {pipeline_mode = #tpu.pipeline_mode<synchronous>, transform_indices = @transform_9, window_bounds = array<i64: 8, 32>}, {pipeline_mode = #tpu.pipeline_mode<synchronous>, transform_indices = @transform_10, window_bounds = array<i64: 1, 16>}, {transform_indices = @transform_11, window_bounds = array<i64: 1, 8, 16>}]} {
    %c0_i32 = arith.constant 0 : i32
    %0 = arith.cmpi eq, %arg1, %c0_i32 : i32
    %1 = arith.extui %0 : i1 to i32
    %c0_i32_0 = arith.constant 0 : i32
    %2 = arith.cmpi ne, %1, %c0_i32_0 : i32
    scf.if %2 {
      %c0_i32_81 = arith.constant 0 : i32
      %244 = tpu.memref_slice %arg16[%c0_i32_81] : memref<2x!tpu.dma_semaphore, #tpu.memory_space<semaphore_mem>> -> memref<1x!tpu.dma_semaphore, #tpu.memory_space<semaphore_mem>>
      %245 = tpu.memref_squeeze %244 : memref<1x!tpu.dma_semaphore, #tpu.memory_space<semaphore_mem>> -> memref<!tpu.dma_semaphore, #tpu.memory_space<semaphore_mem>>
      tpu.enqueue_dma source(%arg3 : memref<16x64xbf16, #tpu.memory_space<any>>) target(%arg14 : memref<16x64xbf16, #tpu.memory_space<vmem>>) target_semaphore(%245 : memref<!tpu.dma_semaphore, #tpu.memory_space<semaphore_mem>>)
      %c1_i32_82 = arith.constant 1 : i32
      %246 = tpu.memref_slice %arg16[%c1_i32_82] : memref<2x!tpu.dma_semaphore, #tpu.memory_space<semaphore_mem>> -> memref<1x!tpu.dma_semaphore, #tpu.memory_space<semaphore_mem>>
      %247 = tpu.memref_squeeze %246 : memref<1x!tpu.dma_semaphore, #tpu.memory_space<semaphore_mem>> -> memref<!tpu.dma_semaphore, #tpu.memory_space<semaphore_mem>>
      tpu.enqueue_dma source(%arg4 : memref<32x16xbf16, #tpu.memory_space<any>>) target(%arg15 : memref<32x16xbf16, #tpu.memory_space<vmem>>) target_semaphore(%247 : memref<!tpu.dma_semaphore, #tpu.memory_space<semaphore_mem>>)
      %c0_i32_83 = arith.constant 0 : i32
      %248 = tpu.memref_slice %arg16[%c0_i32_83] : memref<2x!tpu.dma_semaphore, #tpu.memory_space<semaphore_mem>> -> memref<1x!tpu.dma_semaphore, #tpu.memory_space<semaphore_mem>>
      %249 = tpu.memref_squeeze %248 : memref<1x!tpu.dma_semaphore, #tpu.memory_space<semaphore_mem>> -> memref<!tpu.dma_semaphore, #tpu.memory_space<semaphore_mem>>
      tpu.wait_dma2 semaphore(%249 : memref<!tpu.dma_semaphore, #tpu.memory_space<semaphore_mem>>) src(%arg3 : memref<16x64xbf16, #tpu.memory_space<any>>) dst(%arg14 : memref<16x64xbf16, #tpu.memory_space<vmem>>)
      %c1_i32_84 = arith.constant 1 : i32
      %250 = tpu.memref_slice %arg16[%c1_i32_84] : memref<2x!tpu.dma_semaphore, #tpu.memory_space<semaphore_mem>> -> memref<1x!tpu.dma_semaphore, #tpu.memory_space<semaphore_mem>>
      %251 = tpu.memref_squeeze %250 : memref<1x!tpu.dma_semaphore, #tpu.memory_space<semaphore_mem>> -> memref<!tpu.dma_semaphore, #tpu.memory_space<semaphore_mem>>
      tpu.wait_dma2 semaphore(%251 : memref<!tpu.dma_semaphore, #tpu.memory_space<semaphore_mem>>) src(%arg4 : memref<32x16xbf16, #tpu.memory_space<any>>) dst(%arg15 : memref<32x16xbf16, #tpu.memory_space<vmem>>)
      %cst_85 = arith.constant 0.000000e+00 : f32
      %252 = vector.broadcast %cst_85 : f32 to vector<2x32xf32>
      %c0_86 = arith.constant 0 : index
      %c0_87 = arith.constant 0 : index
      %253 = vector.load %arg22[%c0_86, %c0_87] : memref<10x32xf32, #tpu.memory_space<vmem>>, vector<2x32xf32>
      tpu.vector_store %arg22[%c0_86, %c0_87], %252 {strides = array<i32>} : memref<10x32xf32, #tpu.memory_space<vmem>>, vector<2x32xf32>,
    } else {
    }
    %c8_i32 = arith.constant 8 : i32
    %3 = arith.muli %arg1, %c8_i32 : i32
    %c256_i32 = arith.constant 256 : i32
    %c0_i32_1 = arith.constant 0 : i32
    %4 = arith.cmpi eq, %c256_i32, %c0_i32_1 : i32
    %c1_i32 = arith.constant 1 : i32
    %5 = arith.select %4, %c1_i32, %c256_i32 : i32
    %6 = arith.remsi %3, %5 : i32
    %c0_i32_2 = arith.constant 0 : i32
    %7 = arith.cmpi ne, %6, %c0_i32_2 : i32
    %c0_i32_3 = arith.constant 0 : i32
    %8 = arith.cmpi slt, %6, %c0_i32_3 : i32
    %c0_i32_4 = arith.constant 0 : i32
    %9 = arith.cmpi slt, %5, %c0_i32_4 : i32
    %10 = arith.xori %8, %9 : i1
    %11 = arith.andi %10, %7 : i1
    %12 = arith.addi %6, %5 : i32
    %13 = arith.select %11, %12, %6 : i32
    %c0_i32_5 = arith.constant 0 : i32
    %14 = arith.cmpi eq, %13, %c0_i32_5 : i32
    %15 = arith.extui %14 : i1 to i32
    %c0_i32_6 = arith.constant 0 : i32
    %16 = arith.cmpi ne, %15, %c0_i32_6 : i32
    scf.if %16 {
      %cst_81 = arith.constant 0.000000e+00 : f32
      %244 = vector.broadcast %cst_81 : f32 to vector<8x32xf32>
      %c0_82 = arith.constant 0 : index
      %c0_83 = arith.constant 0 : index
      %245 = vector.load %arg21[%c0_82, %c0_83] : memref<8x32xf32, #tpu.memory_space<vmem>>, vector<8x32xf32>
      tpu.vector_store %arg21[%c0_82, %c0_83], %244 {strides = array<i32>} : memref<8x32xf32, #tpu.memory_space<vmem>>, vector<8x32xf32>,
    } else {
    }
    %c0 = arith.constant 0 : index
    %c0_7 = arith.constant 0 : index
    %c0_8 = arith.constant 0 : index
    %17 = vector.load %arg2[%c0, %c0_7, %c0_8] : memref<1x8x16xbf16, #tpu.memory_space<vmem>>, vector<1x8x16xbf16>
    %18 = vector.shape_cast %17 : vector<1x8x16xbf16> to vector<8x16xbf16>
    %c0_9 = arith.constant 0 : index
    %c0_10 = arith.constant 0 : index
    %19 = vector.load %arg14[%c0_9, %c0_10] : memref<16x64xbf16, #tpu.memory_space<vmem>>, vector<16x64xbf16>
    %cst = arith.constant dense<0.000000e+00> : vector<8x64xf32>
    %20 = tpu.matmul %18, %19, %cst {dimension_numbers = #tpu.dot_dimension_numbers<[1], [0], [0], [1], [0, 0, 1, 1], [], []>} : vector<8x16xbf16>, vector<16x64xbf16>, vector<8x64xf32> -> vector<8x64xf32>
    %c0_11 = arith.constant 0 : index
    %c0_12 = arith.constant 0 : index
    %21 = vector.load %arg7[%c0_11, %c0_12] : memref<1x64xf32, #tpu.memory_space<vmem>>, vector<1x64xf32>
    %22 = vector.broadcast %21 : vector<1x64xf32> to vector<8x64xf32>
    %23 = arith.addf %20, %22 : vector<8x64xf32>
    %24 = vector.extract_strided_slice %23 {offsets = [0, 0], sizes = [8, 32], strides = [1, 1]} : vector<8x64xf32> to vector<8x32xf32>
    %25 = vector.extract_strided_slice %23 {offsets = [0, 32], sizes = [8, 32], strides = [1, 1]} : vector<8x64xf32> to vector<8x32xf32>
    %c2 = arith.constant 2 : index
    %c0_13 = arith.constant 0 : index
    %26 = vector.load %arg22[%c2, %c0_13] : memref<10x32xf32, #tpu.memory_space<vmem>>, vector<8x32xf32>
    tpu.vector_store %arg22[%c2, %c0_13], %24 {strides = array<i32>} : memref<10x32xf32, #tpu.memory_space<vmem>>, vector<8x32xf32>,
    %c0_14 = arith.constant 0 : index
    %c0_15 = arith.constant 0 : index
    %27 = vector.load %arg22[%c0_14, %c0_15] : memref<10x32xf32, #tpu.memory_space<vmem>>, vector<8x32xf32>
    %c0_16 = arith.constant 0 : index
    %c0_17 = arith.constant 0 : index
    %28 = vector.load %arg8[%c0_16, %c0_17] : memref<3x32xf32, #tpu.memory_space<vmem>>, vector<1x32xf32>
    %29 = vector.broadcast %28 : vector<1x32xf32> to vector<8x32xf32>
    %30 = arith.mulf %27, %29 : vector<8x32xf32>
    %c1 = arith.constant 1 : index
    %c0_18 = arith.constant 0 : index
    %31 = vector.load %arg22[%c1, %c0_18] : memref<10x32xf32, #tpu.memory_space<vmem>>, vector<8x32xf32>
    %c1_19 = arith.constant 1 : index
    %c0_20 = arith.constant 0 : index
    %32 = vector.load %arg8[%c1_19, %c0_20] : memref<3x32xf32, #tpu.memory_space<vmem>>, vector<1x32xf32>
    %33 = vector.broadcast %32 : vector<1x32xf32> to vector<8x32xf32>
    %34 = arith.mulf %31, %33 : vector<8x32xf32>
    %35 = arith.addf %30, %34 : vector<8x32xf32>
    %c2_21 = arith.constant 2 : index
    %c0_22 = arith.constant 0 : index
    %36 = vector.load %arg22[%c2_21, %c0_22] : memref<10x32xf32, #tpu.memory_space<vmem>>, vector<8x32xf32>
    %c2_23 = arith.constant 2 : index
    %c0_24 = arith.constant 0 : index
    %37 = vector.load %arg8[%c2_23, %c0_24] : memref<3x32xf32, #tpu.memory_space<vmem>>, vector<1x32xf32>
    %38 = vector.broadcast %37 : vector<1x32xf32> to vector<8x32xf32>
    %39 = arith.mulf %36, %38 : vector<8x32xf32>
    %40 = arith.addf %35, %39 : vector<8x32xf32>
    %c8 = arith.constant 8 : index
    %c0_25 = arith.constant 0 : index
    %41 = vector.load %arg22[%c8, %c0_25] : memref<10x32xf32, #tpu.memory_space<vmem>>, vector<2x32xf32>
    %c0_26 = arith.constant 0 : index
    %c0_27 = arith.constant 0 : index
    %42 = vector.load %arg22[%c0_26, %c0_27] : memref<10x32xf32, #tpu.memory_space<vmem>>, vector<2x32xf32>
    tpu.vector_store %arg22[%c0_26, %c0_27], %41 {strides = array<i32>} : memref<10x32xf32, #tpu.memory_space<vmem>>, vector<2x32xf32>,
    %c0_28 = arith.constant 0 : index
    %c0_29 = arith.constant 0 : index
    %43 = vector.load %arg9[%c0_28, %c0_29] : memref<1x32xf32, #tpu.memory_space<vmem>>, vector<1x32xf32>
    %44 = vector.broadcast %43 : vector<1x32xf32> to vector<8x32xf32>
    %45 = arith.addf %40, %44 : vector<8x32xf32>
    %46 = arith.negf %45 : vector<8x32xf32>
    %47 = math.exp %46 : vector<8x32xf32>
    %cst_30 = arith.constant 1.000000e+00 : f32
    %48 = vector.broadcast %cst_30 : f32 to vector<8x32xf32>
    %49 = arith.addf %48, %47 : vector<8x32xf32>
    %50 = arith.divf %48, %49 : vector<8x32xf32>
    %51 = arith.mulf %45, %50 : vector<8x32xf32>
    %52 = arith.truncf %51 : vector<8x32xf32> to vector<8x32xbf16>
    %c0_31 = arith.constant 0 : index
    %c0_32 = arith.constant 0 : index
    %53 = vector.load %arg5[%c0_31, %c0_32] : memref<32x144xbf16, #tpu.memory_space<vmem>>, vector<32x144xbf16>
    %cst_33 = arith.constant dense<0.000000e+00> : vector<8x144xf32>
    %54 = tpu.matmul %52, %53, %cst_33 {dimension_numbers = #tpu.dot_dimension_numbers<[1], [0], [0], [1], [0, 0, 1, 1], [], []>} : vector<8x32xbf16>, vector<32x144xbf16>, vector<8x144xf32> -> vector<8x144xf32>
    %55 = vector.extract_strided_slice %54 {offsets = [0, 0], sizes = [8, 128], strides = [1, 1]} : vector<8x144xf32> to vector<8x128xf32>
    %56 = arith.truncf %55 : vector<8x128xf32> to vector<8x128xbf16>
    %c0_34 = arith.constant 0 : index
    %c0_35 = arith.constant 0 : index
    %57 = vector.load %arg6[%c0_34, %c0_35] : memref<128x32xbf16, #tpu.memory_space<vmem>>, vector<128x32xbf16>
    %cst_36 = arith.constant dense<0.000000e+00> : vector<8x32xf32>
    %58 = tpu.matmul %56, %57, %cst_36 {dimension_numbers = #tpu.dot_dimension_numbers<[1], [0], [0], [1], [0, 0, 1, 1], [], []>} : vector<8x128xbf16>, vector<128x32xbf16>, vector<8x32xf32> -> vector<8x32xf32>
    %c0_37 = arith.constant 0 : index
    %c0_38 = arith.constant 0 : index
    %59 = vector.load %arg10[%c0_37, %c0_38] : memref<1x32xf32, #tpu.memory_space<vmem>>, vector<1x32xf32>
    %60 = vector.broadcast %59 : vector<1x32xf32> to vector<8x32xf32>
    %61 = arith.addf %58, %60 : vector<8x32xf32>
    %cst_39 = arith.constant 0.000000e+00 : f32
    %62 = vector.broadcast %cst_39 : f32 to vector<8x32xf32>
    %63 = arith.maximumf %61, %62 : vector<8x32xf32>
    %64 = vector.broadcast %cst_39 : f32 to vector<8x32xf32>
    %65 = arith.subf %61, %64 : vector<8x32xf32>
    %66 = arith.cmpf one, %65, %65 : vector<8x32xf32>
    %67 = vector.broadcast %cst_39 : f32 to vector<8x32xf32>
    %68 = arith.addf %61, %67 : vector<8x32xf32>
    %69 = math.absf %65 : vector<8x32xf32>
    %cst_40 = arith.constant 0.000000e+00 : f32
    %70 = vector.broadcast %cst_40 : f32 to vector<8x32xf32>
    %71 = arith.subf %70, %69 : vector<8x32xf32>
    %72 = math.exp %71 : vector<8x32xf32>
    %73 = math.log1p %72 : vector<8x32xf32>
    %74 = arith.addf %63, %73 : vector<8x32xf32>
    %75 = arith.select %66, %68, %74 : vector<8x32xi1>, vector<8x32xf32>
    %76 = vector.extract_strided_slice %54 {offsets = [0, 128], sizes = [8, 16], strides = [1, 1]} : vector<8x144xf32> to vector<8x16xf32>
    %c0_41 = arith.constant 0 : index
    %c0_42 = arith.constant 0 : index
    %77 = vector.load %arg17[%c0_41, %c0_42] : memref<8x32xf32, #tpu.memory_space<vmem>>, vector<8x32xf32>
    tpu.vector_store %arg17[%c0_41, %c0_42], %75 {strides = array<i32>} : memref<8x32xf32, #tpu.memory_space<vmem>>, vector<8x32xf32>,
    %78 = arith.mulf %75, %51 : vector<8x32xf32>
    %c0_43 = arith.constant 0 : index
    %c0_44 = arith.constant 0 : index
    %79 = vector.load %arg18[%c0_43, %c0_44] : memref<8x32xf32, #tpu.memory_space<vmem>>, vector<8x32xf32>
    tpu.vector_store %arg18[%c0_43, %c0_44], %78 {strides = array<i32>} : memref<8x32xf32, #tpu.memory_space<vmem>>, vector<8x32xf32>,
    %80 = tpu.transpose %76, [1, 0] : vector<8x16xf32> -> vector<16x8xf32>
    %c0_45 = arith.constant 0 : index
    %c0_46 = arith.constant 0 : index
    %c0_47 = arith.constant 0 : index
    %81 = vector.load %arg19[%c0_45, %c0_46, %c0_47] : memref<1x16x8xf32, #tpu.memory_space<vmem>>, vector<1x16x8xf32>
    %82 = vector.shape_cast %81 : vector<1x16x8xf32> to vector<16x8xf32>
    %83 = vector.shape_cast %80 : vector<16x8xf32> to vector<1x16x8xf32>
    tpu.vector_store %arg19[%c0_45, %c0_46, %c0_47], %83 {strides = array<i32>} : memref<1x16x8xf32, #tpu.memory_space<vmem>>, vector<1x16x8xf32>,
    %c0_48 = arith.constant 0 : index
    %c0_49 = arith.constant 0 : index
    %84 = vector.load %arg11[%c0_48, %c0_49] : memref<8x32xf32, #tpu.memory_space<vmem>>, vector<8x32xf32>
    %c0_50 = arith.constant 0 : index
    %c0_51 = arith.constant 0 : index
    %85 = vector.load %arg21[%c0_50, %c0_51] : memref<8x32xf32, #tpu.memory_space<vmem>>, vector<8x32xf32>
    %c0_i32_52 = arith.constant 0 : i32
    %c8_i32_53 = arith.constant 8 : i32
    %86 = arith.muli %c0_i32_52, %c8_i32_53 : i32
    %87 = tpu.assume_multiple %86, 8 : i32
    %88 = arith.index_cast %87 : i32 to index
    %c0_54 = arith.constant 0 : index
    %89 = vector.load %arg17[%88, %c0_54] : memref<8x32xf32, #tpu.memory_space<vmem>>, vector<8x32xf32>
    %90 = arith.index_cast %87 : i32 to index
    %c0_55 = arith.constant 0 : index
    %91 = vector.load %arg18[%90, %c0_55] : memref<8x32xf32, #tpu.memory_space<vmem>>, vector<8x32xf32>
    %92 = arith.index_cast %c0_i32_52 : i32 to index
    %c0_56 = arith.constant 0 : index
    %c0_57 = arith.constant 0 : index
    %93 = vector.load %arg19[%92, %c0_56, %c0_57] : memref<1x16x8xf32, #tpu.memory_space<vmem>>, vector<1x16x8xf32>
    %94 = vector.shape_cast %93 : vector<1x16x8xf32> to vector<16x8xf32>
    %95 = vector.extract_strided_slice %89 {offsets = [0, 0], sizes = [1, 32], strides = [1, 1]} : vector<8x32xf32> to vector<1x32xf32>
    %96 = vector.broadcast %95 : vector<1x32xf32> to vector<8x32xf32>
    %97 = arith.mulf %96, %84 : vector<8x32xf32>
    %98 = math.exp %97 : vector<8x32xf32>
    %99 = vector.extract_strided_slice %94 {offsets = [0, 0], sizes = [8, 1], strides = [1, 1]} : vector<16x8xf32> to vector<8x1xf32>
    %100 = vector.extract_strided_slice %94 {offsets = [8, 0], sizes = [8, 1], strides = [1, 1]} : vector<16x8xf32> to vector<8x1xf32>
    %101 = arith.mulf %98, %85 : vector<8x32xf32>
    %102 = vector.extract_strided_slice %91 {offsets = [0, 0], sizes = [1, 32], strides = [1, 1]} : vector<8x32xf32> to vector<1x32xf32>
    %103 = vector.broadcast %99 : vector<8x1xf32> to vector<8x32xf32>
    %104 = vector.broadcast %102 : vector<1x32xf32> to vector<8x32xf32>
    %105 = arith.mulf %103, %104 : vector<8x32xf32>
    %106 = arith.addf %101, %105 : vector<8x32xf32>
    %107 = vector.broadcast %100 : vector<8x1xf32> to vector<8x32xf32>
    %108 = arith.mulf %106, %107 : vector<8x32xf32>
    %cst_58 = arith.constant dense<0.000000e+00> : vector<32xf32>
    %109 = vector.multi_reduction <add>, %108, %cst_58 [0] : vector<8x32xf32> to vector<32xf32>
    %110 = vector.shape_cast %109 : vector<32xf32> to vector<1x32xf32>
    %111 = vector.extract_strided_slice %89 {offsets = [1, 0], sizes = [1, 32], strides = [1, 1]} : vector<8x32xf32> to vector<1x32xf32>
    %112 = vector.broadcast %111 : vector<1x32xf32> to vector<8x32xf32>
    %113 = arith.mulf %112, %84 : vector<8x32xf32>
    %114 = math.exp %113 : vector<8x32xf32>
    %115 = vector.extract_strided_slice %94 {offsets = [0, 1], sizes = [8, 1], strides = [1, 1]} : vector<16x8xf32> to vector<8x1xf32>
    %116 = vector.extract_strided_slice %94 {offsets = [8, 1], sizes = [8, 1], strides = [1, 1]} : vector<16x8xf32> to vector<8x1xf32>
    %117 = arith.mulf %114, %106 : vector<8x32xf32>
    %118 = vector.extract_strided_slice %91 {offsets = [1, 0], sizes = [1, 32], strides = [1, 1]} : vector<8x32xf32> to vector<1x32xf32>
    %119 = vector.broadcast %115 : vector<8x1xf32> to vector<8x32xf32>
    %120 = vector.broadcast %118 : vector<1x32xf32> to vector<8x32xf32>
    %121 = arith.mulf %119, %120 : vector<8x32xf32>
    %122 = arith.addf %117, %121 : vector<8x32xf32>
    %123 = vector.broadcast %116 : vector<8x1xf32> to vector<8x32xf32>
    %124 = arith.mulf %122, %123 : vector<8x32xf32>
    %cst_59 = arith.constant dense<0.000000e+00> : vector<32xf32>
    %125 = vector.multi_reduction <add>, %124, %cst_59 [0] : vector<8x32xf32> to vector<32xf32>
    %126 = vector.shape_cast %125 : vector<32xf32> to vector<1x32xf32>
    %127 = vector.extract_strided_slice %89 {offsets = [2, 0], sizes = [1, 32], strides = [1, 1]} : vector<8x32xf32> to vector<1x32xf32>
    %128 = vector.broadcast %127 : vector<1x32xf32> to vector<8x32xf32>
    %129 = arith.mulf %128, %84 : vector<8x32xf32>
    %130 = math.exp %129 : vector<8x32xf32>
    %131 = vector.extract_strided_slice %94 {offsets = [0, 2], sizes = [8, 1], strides = [1, 1]} : vector<16x8xf32> to vector<8x1xf32>
    %132 = vector.extract_strided_slice %94 {offsets = [8, 2], sizes = [8, 1], strides = [1, 1]} : vector<16x8xf32> to vector<8x1xf32>
    %133 = arith.mulf %130, %122 : vector<8x32xf32>
    %134 = vector.extract_strided_slice %91 {offsets = [2, 0], sizes = [1, 32], strides = [1, 1]} : vector<8x32xf32> to vector<1x32xf32>
    %135 = vector.broadcast %131 : vector<8x1xf32> to vector<8x32xf32>
    %136 = vector.broadcast %134 : vector<1x32xf32> to vector<8x32xf32>
    %137 = arith.mulf %135, %136 : vector<8x32xf32>
    %138 = arith.addf %133, %137 : vector<8x32xf32>
    %139 = vector.broadcast %132 : vector<8x1xf32> to vector<8x32xf32>
    %140 = arith.mulf %138, %139 : vector<8x32xf32>
    %cst_60 = arith.constant dense<0.000000e+00> : vector<32xf32>
    %141 = vector.multi_reduction <add>, %140, %cst_60 [0] : vector<8x32xf32> to vector<32xf32>
    %142 = vector.shape_cast %141 : vector<32xf32> to vector<1x32xf32>
    %143 = vector.extract_strided_slice %89 {offsets = [3, 0], sizes = [1, 32], strides = [1, 1]} : vector<8x32xf32> to vector<1x32xf32>
    %144 = vector.broadcast %143 : vector<1x32xf32> to vector<8x32xf32>
    %145 = arith.mulf %144, %84 : vector<8x32xf32>
    %146 = math.exp %145 : vector<8x32xf32>
    %147 = vector.extract_strided_slice %94 {offsets = [0, 3], sizes = [8, 1], strides = [1, 1]} : vector<16x8xf32> to vector<8x1xf32>
    %148 = vector.extract_strided_slice %94 {offsets = [8, 3], sizes = [8, 1], strides = [1, 1]} : vector<16x8xf32> to vector<8x1xf32>
    %149 = arith.mulf %146, %138 : vector<8x32xf32>
    %150 = vector.extract_strided_slice %91 {offsets = [3, 0], sizes = [1, 32], strides = [1, 1]} : vector<8x32xf32> to vector<1x32xf32>
    %151 = vector.broadcast %147 : vector<8x1xf32> to vector<8x32xf32>
    %152 = vector.broadcast %150 : vector<1x32xf32> to vector<8x32xf32>
    %153 = arith.mulf %151, %152 : vector<8x32xf32>
    %154 = arith.addf %149, %153 : vector<8x32xf32>
    %155 = vector.broadcast %148 : vector<8x1xf32> to vector<8x32xf32>
    %156 = arith.mulf %154, %155 : vector<8x32xf32>
    %cst_61 = arith.constant dense<0.000000e+00> : vector<32xf32>
    %157 = vector.multi_reduction <add>, %156, %cst_61 [0] : vector<8x32xf32> to vector<32xf32>
    %158 = vector.shape_cast %157 : vector<32xf32> to vector<1x32xf32>
    %159 = vector.extract_strided_slice %89 {offsets = [4, 0], sizes = [1, 32], strides = [1, 1]} : vector<8x32xf32> to vector<1x32xf32>
    %160 = vector.broadcast %159 : vector<1x32xf32> to vector<8x32xf32>
    %161 = arith.mulf %160, %84 : vector<8x32xf32>
    %162 = math.exp %161 : vector<8x32xf32>
    %163 = vector.extract_strided_slice %94 {offsets = [0, 4], sizes = [8, 1], strides = [1, 1]} : vector<16x8xf32> to vector<8x1xf32>
    %164 = vector.extract_strided_slice %94 {offsets = [8, 4], sizes = [8, 1], strides = [1, 1]} : vector<16x8xf32> to vector<8x1xf32>
    %165 = arith.mulf %162, %154 : vector<8x32xf32>
    %166 = vector.extract_strided_slice %91 {offsets = [4, 0], sizes = [1, 32], strides = [1, 1]} : vector<8x32xf32> to vector<1x32xf32>
    %167 = vector.broadcast %163 : vector<8x1xf32> to vector<8x32xf32>
    %168 = vector.broadcast %166 : vector<1x32xf32> to vector<8x32xf32>
    %169 = arith.mulf %167, %168 : vector<8x32xf32>
    %170 = arith.addf %165, %169 : vector<8x32xf32>
    %171 = vector.broadcast %164 : vector<8x1xf32> to vector<8x32xf32>
    %172 = arith.mulf %170, %171 : vector<8x32xf32>
    %cst_62 = arith.constant dense<0.000000e+00> : vector<32xf32>
    %173 = vector.multi_reduction <add>, %172, %cst_62 [0] : vector<8x32xf32> to vector<32xf32>
    %174 = vector.shape_cast %173 : vector<32xf32> to vector<1x32xf32>
    %175 = vector.extract_strided_slice %89 {offsets = [5, 0], sizes = [1, 32], strides = [1, 1]} : vector<8x32xf32> to vector<1x32xf32>
    %176 = vector.broadcast %175 : vector<1x32xf32> to vector<8x32xf32>
    %177 = arith.mulf %176, %84 : vector<8x32xf32>
    %178 = math.exp %177 : vector<8x32xf32>
    %179 = vector.extract_strided_slice %94 {offsets = [0, 5], sizes = [8, 1], strides = [1, 1]} : vector<16x8xf32> to vector<8x1xf32>
    %180 = vector.extract_strided_slice %94 {offsets = [8, 5], sizes = [8, 1], strides = [1, 1]} : vector<16x8xf32> to vector<8x1xf32>
    %181 = arith.mulf %178, %170 : vector<8x32xf32>
    %182 = vector.extract_strided_slice %91 {offsets = [5, 0], sizes = [1, 32], strides = [1, 1]} : vector<8x32xf32> to vector<1x32xf32>
    %183 = vector.broadcast %179 : vector<8x1xf32> to vector<8x32xf32>
    %184 = vector.broadcast %182 : vector<1x32xf32> to vector<8x32xf32>
    %185 = arith.mulf %183, %184 : vector<8x32xf32>
    %186 = arith.addf %181, %185 : vector<8x32xf32>
    %187 = vector.broadcast %180 : vector<8x1xf32> to vector<8x32xf32>
    %188 = arith.mulf %186, %187 : vector<8x32xf32>
    %cst_63 = arith.constant dense<0.000000e+00> : vector<32xf32>
    %189 = vector.multi_reduction <add>, %188, %cst_63 [0] : vector<8x32xf32> to vector<32xf32>
    %190 = vector.shape_cast %189 : vector<32xf32> to vector<1x32xf32>
    %191 = vector.extract_strided_slice %89 {offsets = [6, 0], sizes = [1, 32], strides = [1, 1]} : vector<8x32xf32> to vector<1x32xf32>
    %192 = vector.broadcast %191 : vector<1x32xf32> to vector<8x32xf32>
    %193 = arith.mulf %192, %84 : vector<8x32xf32>
    %194 = math.exp %193 : vector<8x32xf32>
    %195 = vector.extract_strided_slice %94 {offsets = [0, 6], sizes = [8, 1], strides = [1, 1]} : vector<16x8xf32> to vector<8x1xf32>
    %196 = vector.extract_strided_slice %94 {offsets = [8, 6], sizes = [8, 1], strides = [1, 1]} : vector<16x8xf32> to vector<8x1xf32>
    %197 = arith.mulf %194, %186 : vector<8x32xf32>
    %198 = vector.extract_strided_slice %91 {offsets = [6, 0], sizes = [1, 32], strides = [1, 1]} : vector<8x32xf32> to vector<1x32xf32>
    %199 = vector.broadcast %195 : vector<8x1xf32> to vector<8x32xf32>
    %200 = vector.broadcast %198 : vector<1x32xf32> to vector<8x32xf32>
    %201 = arith.mulf %199, %200 : vector<8x32xf32>
    %202 = arith.addf %197, %201 : vector<8x32xf32>
    %203 = vector.broadcast %196 : vector<8x1xf32> to vector<8x32xf32>
    %204 = arith.mulf %202, %203 : vector<8x32xf32>
    %cst_64 = arith.constant dense<0.000000e+00> : vector<32xf32>
    %205 = vector.multi_reduction <add>, %204, %cst_64 [0] : vector<8x32xf32> to vector<32xf32>
    %206 = vector.shape_cast %205 : vector<32xf32> to vector<1x32xf32>
    %207 = vector.extract_strided_slice %89 {offsets = [7, 0], sizes = [1, 32], strides = [1, 1]} : vector<8x32xf32> to vector<1x32xf32>
    %208 = vector.broadcast %207 : vector<1x32xf32> to vector<8x32xf32>
    %209 = arith.mulf %208, %84 : vector<8x32xf32>
    %210 = math.exp %209 : vector<8x32xf32>
    %211 = vector.extract_strided_slice %94 {offsets = [0, 7], sizes = [8, 1], strides = [1, 1]} : vector<16x8xf32> to vector<8x1xf32>
    %212 = vector.extract_strided_slice %94 {offsets = [8, 7], sizes = [8, 1], strides = [1, 1]} : vector<16x8xf32> to vector<8x1xf32>
    %213 = arith.mulf %210, %202 : vector<8x32xf32>
    %214 = vector.extract_strided_slice %91 {offsets = [7, 0], sizes = [1, 32], strides = [1, 1]} : vector<8x32xf32> to vector<1x32xf32>
    %215 = vector.broadcast %211 : vector<8x1xf32> to vector<8x32xf32>
    %216 = vector.broadcast %214 : vector<1x32xf32> to vector<8x32xf32>
    %217 = arith.mulf %215, %216 : vector<8x32xf32>
    %218 = arith.addf %213, %217 : vector<8x32xf32>
    %219 = vector.broadcast %212 : vector<8x1xf32> to vector<8x32xf32>
    %220 = arith.mulf %218, %219 : vector<8x32xf32>
    %cst_65 = arith.constant dense<0.000000e+00> : vector<32xf32>
    %221 = vector.multi_reduction <add>, %220, %cst_65 [0] : vector<8x32xf32> to vector<32xf32>
    %222 = vector.shape_cast %221 : vector<32xf32> to vector<1x32xf32>
    %223 = tpu.concatenate %110, %126, %142, %158, %174, %190, %206, %222 in 0 : vector<1x32xf32>, vector<1x32xf32>, vector<1x32xf32>, vector<1x32xf32>, vector<1x32xf32>, vector<1x32xf32>, vector<1x32xf32>, vector<1x32xf32> -> vector<8x32xf32>
    %224 = arith.index_cast %87 : i32 to index
    %c0_66 = arith.constant 0 : index
    %225 = vector.load %arg20[%224, %c0_66] : memref<8x32xf32, #tpu.memory_space<vmem>>, vector<8x32xf32>
    tpu.vector_store %arg20[%224, %c0_66], %223 {strides = array<i32>} : memref<8x32xf32, #tpu.memory_space<vmem>>, vector<8x32xf32>,
    %c1_i32_67 = arith.constant 1 : i32
    %c0_68 = arith.constant 0 : index
    %c0_69 = arith.constant 0 : index
    %226 = vector.load %arg21[%c0_68, %c0_69] : memref<8x32xf32, #tpu.memory_space<vmem>>, vector<8x32xf32>
    tpu.vector_store %arg21[%c0_68, %c0_69], %218 {strides = array<i32>} : memref<8x32xf32, #tpu.memory_space<vmem>>, vector<8x32xf32>,
    %c0_70 = arith.constant 0 : index
    %c0_71 = arith.constant 0 : index
    %227 = vector.load %arg20[%c0_70, %c0_71] : memref<8x32xf32, #tpu.memory_space<vmem>>, vector<8x32xf32>
    %228 = arith.negf %25 : vector<8x32xf32>
    %229 = math.exp %228 : vector<8x32xf32>
    %cst_72 = arith.constant 1.000000e+00 : f32
    %230 = vector.broadcast %cst_72 : f32 to vector<8x32xf32>
    %231 = arith.addf %230, %229 : vector<8x32xf32>
    %232 = arith.divf %230, %231 : vector<8x32xf32>
    %233 = arith.mulf %25, %232 : vector<8x32xf32>
    %234 = arith.mulf %227, %233 : vector<8x32xf32>
    %235 = arith.truncf %234 : vector<8x32xf32> to vector<8x32xbf16>
    %c0_73 = arith.constant 0 : index
    %c0_74 = arith.constant 0 : index
    %236 = vector.load %arg15[%c0_73, %c0_74] : memref<32x16xbf16, #tpu.memory_space<vmem>>, vector<32x16xbf16>
    %cst_75 = arith.constant dense<0.000000e+00> : vector<8x16xf32>
    %237 = tpu.matmul %235, %236, %cst_75 {dimension_numbers = #tpu.dot_dimension_numbers<[1], [0], [0], [1], [0, 0, 1, 1], [], []>} : vector<8x32xbf16>, vector<32x16xbf16>, vector<8x16xf32> -> vector<8x16xf32>
    %c0_76 = arith.constant 0 : index
    %c0_77 = arith.constant 0 : index
    %238 = vector.load %arg12[%c0_76, %c0_77] : memref<1x16xf32, #tpu.memory_space<vmem>>, vector<1x16xf32>
    %239 = vector.broadcast %238 : vector<1x16xf32> to vector<8x16xf32>
    %240 = arith.addf %237, %239 : vector<8x16xf32>
    %c0_78 = arith.constant 0 : index
    %c0_79 = arith.constant 0 : index
    %c0_80 = arith.constant 0 : index
    %241 = vector.load %arg13[%c0_78, %c0_79, %c0_80] : memref<1x8x16xf32, #tpu.memory_space<vmem>>, vector<1x8x16xf32>
    %242 = vector.shape_cast %241 : vector<1x8x16xf32> to vector<8x16xf32>
    %243 = vector.shape_cast %240 : vector<8x16xf32> to vector<1x8x16xf32>
    tpu.vector_store %arg13[%c0_78, %c0_79, %c0_80], %243 {strides = array<i32>} : memref<1x8x16xf32, #tpu.memory_space<vmem>>, vector<1x8x16xf32>,
    return
  }
  func.func @transform_0(%arg0: i32, %arg1: i32) -> (i32, i32, i32) {
    %c0_i32 = arith.constant 0 : i32
    %c0_i32_0 = arith.constant 0 : i32
    return %arg0, %arg1, %c0_i32 : i32, i32, i32
  }
  func.func @transform_3(%arg0: i32, %arg1: i32) -> (i32, i32) {
    %c0_i32 = arith.constant 0 : i32
    %c0_i32_0 = arith.constant 0 : i32
    %c0_i32_1 = arith.constant 0 : i32
    return %c0_i32, %c0_i32_0 : i32, i32
  }
  func.func @transform_4(%arg0: i32, %arg1: i32) -> (i32, i32) {
    %c0_i32 = arith.constant 0 : i32
    %c0_i32_0 = arith.constant 0 : i32
    %c0_i32_1 = arith.constant 0 : i32
    return %c0_i32, %c0_i32_0 : i32, i32
  }
  func.func @transform_5(%arg0: i32, %arg1: i32) -> (i32, i32) {
    %c0_i32 = arith.constant 0 : i32
    %c0_i32_0 = arith.constant 0 : i32
    %c0_i32_1 = arith.constant 0 : i32
    return %c0_i32, %c0_i32_0 : i32, i32
  }
  func.func @transform_6(%arg0: i32, %arg1: i32) -> (i32, i32) {
    %c0_i32 = arith.constant 0 : i32
    %c0_i32_0 = arith.constant 0 : i32
    %c0_i32_1 = arith.constant 0 : i32
    return %c0_i32, %c0_i32_0 : i32, i32
  }
  func.func @transform_7(%arg0: i32, %arg1: i32) -> (i32, i32) {
    %c0_i32 = arith.constant 0 : i32
    %c0_i32_0 = arith.constant 0 : i32
    %c0_i32_1 = arith.constant 0 : i32
    return %c0_i32, %c0_i32_0 : i32, i32
  }
  func.func @transform_8(%arg0: i32, %arg1: i32) -> (i32, i32) {
    %c0_i32 = arith.constant 0 : i32
    %c0_i32_0 = arith.constant 0 : i32
    %c0_i32_1 = arith.constant 0 : i32
    return %c0_i32, %c0_i32_0 : i32, i32
  }
  func.func @transform_9(%arg0: i32, %arg1: i32) -> (i32, i32) {
    %c0_i32 = arith.constant 0 : i32
    %c0_i32_0 = arith.constant 0 : i32
    %c0_i32_1 = arith.constant 0 : i32
    return %c0_i32, %c0_i32_0 : i32, i32
  }
  func.func @transform_10(%arg0: i32, %arg1: i32) -> (i32, i32) {
    %c0_i32 = arith.constant 0 : i32
    %c0_i32_0 = arith.constant 0 : i32
    %c0_i32_1 = arith.constant 0 : i32
    return %c0_i32, %c0_i32_0 : i32, i32
  }
  func.func @transform_11(%arg0: i32, %arg1: i32) -> (i32, i32, i32) {
    %c0_i32 = arith.constant 0 : i32
    %c0_i32_0 = arith.constant 0 : i32
    return %arg0, %arg1, %c0_i32 : i32, i32, i32
  }
}

</mosaic_0001>

<bundles_post_ra>
// kernel: tpu_custom_call.1
= control target key start
LH: loop header
LB: loop body
LE: loop exit
PB: predicated region body
PF: predicated region fallthrough
CT: control target
= control target key end

     0   :  { %16 = vsyncpa [#allocation12], 0  ;;  %s1891_s0 = inlined_call_operand.vmem [shape: bf16[2,8,16], index: 0, kind: input, shape index: {}]   ;;  %s1892_s1 = inlined_call_operand.vmem [shape: bf16[16,64], index: 1, kind: input, shape index: {}]   ;;  %s1893_s2 = inlined_call_operand.vmem [shape: bf16[32,16], index: 2, kind: input, shape index: {}]   ;;  %s1894_s3 = inlined_call_operand.vmem [shape: bf16[32,144], index: 3, kind: input, shape index: {}]   ;;  %s1895_s4 = inlined_call_operand.vmem [shape: bf16[128,32], index: 4, kind: input, shape index: {}]   ;;  %s1896_s5 = inlined_call_operand.vmem [shape: f32[1,64], index: 5, kind: input, shape index: {}]   ;;  %s1897_s6 = inlined_call_operand.vmem [shape: f32[3,32], index: 6, kind: input, shape index: {}]   ;;  %s1898_s7 = inlined_call_operand.vmem [shape: f32[1,32], index: 7, kind: input, shape index: {}]   ;;  %s1899_s8 = inlined_call_operand.vmem [shape: f32[1,32], index: 8, kind: input, shape index: {}]   ;;  %s1900_s9 = inlined_call_operand.vmem [shape: f32[8,32], index: 9, kind: input, shape index: {}]   ;;  %s1901_s10 = inlined_call_operand.vmem [shape: f32[1,16], index: 10, kind: input, shape index: {}]   ;;  %s1902_s11 = inlined_call_operand.hbm [shape: f32[2,8,16], index: 11, kind: output, shape index: {}]  }
   0x1   :  { %18 = vsyncpa [#allocation12 + $0x1], 0  ;;  %s1621_s17 = smov 0   ;;  %s1623_s18 = smov 0  }
   0x2   :  { %s1625_s19 = smov 0   ;;  %s1627_s20 = smov 0  }
   0x3   :  { %s1629_s21 = smov 0   ;;  %s1631_s22 = smov 0  }
   0x4 LB: > { %1906 = sst [smem:[#allocation18_spill]] %s1535_s19  ;;  %s1255_s23 = sadd.s32 4294967295, %s1547_s22   ;;  %s1547_s22 = sphi %s1631_s22, %s24_s22   ;;  %s1543_s21 = sphi %s1629_s21, %s1915_s21   ;;  %s1539_s20 = sphi %s1627_s20, %s1914_s20   ;;  %s1535_s19 = sphi %s1625_s19, %s1913_s19   ;;  %s1531_s18 = sphi %s1623_s18, %s1917_s18   ;;  %s1527_s17 = sphi %s1621_s17, %s1916_s17  }
   0x5   : > { %1907 = sst [smem:[#allocation19_spill]] %s1543_s21  ;;  %s1256_s24 = sadd.s32 4294967294, %s1547_s22  }
   0x6   : > { %s36_s25 = sadd.s32 1, %s1543_s21  ;;  %s241_s26 = sadd.s32 1, %s1535_s19 }
   0x7   : > { %p38_p0 = scmp.ge.s32.totalorder %s36_s25, 2  ;;  %p251_p1 = scmp.ne.s32.totalorder %s1535_s19, %s1531_s18 }
   0x8   : > { %p252_p2 = scmp.eq.s32.totalorder %s1255_s23, 1  ;;  %p257_p3 = scmp.ne.s32.totalorder %s1531_s18, %s1527_s17 }
   0x9   : > { %s1919_s25 = smov (%p38_p0, %s36_s25), 0  ;;  %p258_p5 = scmp.eq.s32.totalorder %s1256_s24, 1 }
   0xa   : > { %1908 = sst [smem:[#allocation20_spill]] %s1919_s25  ;;  %p1661_p4 = por %p252_p2, %p251_p1 }
   0xb   : > { %s236_s28 = ssub.s32 %s1543_s21, %s1919_s25  ;;  %p1259_p6 = scmp.ge.s32.totalorder %s1547_s22, 1 }
   0xc   : > { %p239_p7 = scmp.eq.s32.totalorder %s236_s28, 0  ;;  %p1668_p8 = por %p258_p5, %p257_p3 }
   0xd   : > { %p310_p9 = scmp.lt.s32.totalorder %s1547_s22, 3 }
   0xe   : > { %s1674_s30 = scalar_select %p239_p7, %s1535_s19, %s241_s26  }
   0xf   : > { %p311_p10 = pnand %p1259_p6, %p310_p9 }
  0x10   : > { %1911 = sst [smem:[#allocation21_spill]] %s1674_s30  ;;  %s345_s12 = sand.u32 (!%p311_p10), 1, %s1531_s18   ;;  %v392_v0 = vld [vmem:[%s1892_s1] sm:$0xff] (!%p311_p10) }
  0x11   : > { %314 = sbr.rel (%p311_p10) target bundleno = 1098 (0x44a), region = 56  ;;  %p348_p11 = scmp.lt.s32.totalorder (!%p311_p10), %s1539_s20, 1 }
  0x12   : > { %s1683_s15 = sshll.u32 (!%p311_p10), %s345_s12, 3 }
  0x13   : > { %s347_s25 = scalar_lea.vmem (!%p311_p10), [#allocation11], %s1683_s15 }
  0x18   : > { %s349_s16 = scalar_select %p348_p11, %s1539_s20, 1 }
  0x1a   : > { %s1261_s23 = sshll.u32 %s349_s16, 2 }
  0x1b   : > { %s354_s28 = scalar_lea.vmem %s1891_s0, %s1261_s23 }
  0x1c   : > { %401 = vsyncadd [#allocation4], 128  ;;  %v1693_v1 = vld [vmem:[%s1893_s2] sm:$0xff]  ;;  %v1698_v2 = vld [vmem:[%s1893_s2 + $0x8] sm:$0xff] }
  0x1d   : > { %446 = vsyncadd [#allocation4 + $0x1], 256 }
  0x1e   : > { %1517 = dma.done.wait [#allocation4], 128 }
  0x1f   : > { %1518 = vsyncadd [#allocation4], 4294967168 }
  0x20   : > { %1519 = dma.done.wait [#allocation4 + $0x1], 256 }
  0x21   : > { %1520 = vsyncadd [#allocation4 + $0x1], 4294967040  ;;  %vm474_vm0 = vcmask 261120   ;;  %v1549_v3 = vmov 0.0   ;;  %vm1550_vm1 = vmmov 0   ;;  %vm485_vm2 = vcmask 130048  }
  0x22   : > { %1306 = vmatprep.subr.bf16.mxu1 %v1549_v3  ;;  %1308 = vmatprep.mubr.msk.bf16.mxu1 %vm1550_vm1, %v1549_v3  ;;  %475 = vst.msk [vmem:[#allocation9] sm:$0xff] %vm474_vm0, %v1549_v3  ;;  %v476_v4 = vld [vmem:[%s354_s28] sm:$0xf]  ;;  %vm455_vm3 = vcmask 254976   ;;  %v1425_v6 = vld [vmem:[%s1894_s3 + $0x4] ss:$8 sps:$4 sm:$0xff]  }
  0x23   : > { %1307 = vmatpush3.bf16.msra.mxu1 %v392_v0  ;;  %1312 = vmatprep.subr.bf16.mxu0 %v1549_v3  ;;  %456 = vst.msk [vmem:[#allocation10] sm:$0x3] %vm455_vm3, %v1549_v3  ;;  %v1423_v5 = vld [vmem:[%s1894_s3] ss:$8 sps:$4 sm:$0xff]   ;;  %v1428_v7 = vld [vmem:[%s1894_s3 + $0x14] ss:$8 sps:$4 sm:$0xff]  }
  0x24   : > { %1328 = vmatprep.mubr.msk.bf16.mxu0 %vm1550_vm1, %v1549_v3  ;;  %600 = vmatprep.subr.bf16.mxu1 %v1425_v6  ;;  %v1551_v8 = vmov 0   ;;  %v1426_v9 = vld [vmem:[%s1894_s3 + $0x10] ss:$8 sps:$4 sm:$0xff]   ;;  %v1429_v10 = vld [vmem:[%s1895_s4] sm:$0xff]   ;;  %v1430_v11 = vld [vmem:[%s1895_s4 + $0x8] sm:$0xff]   ;;  %v1552_v49 = vmov 1  }
  0x25   : > { %1313 = vmatpush3.bf16.msra.mxu0 %v1429_v10  ;;  %v1431_v12 = vld [vmem:[%s1895_s4 + $0x10] sm:$0xff]   ;;  %v1432_v13 = vld [vmem:[%s1895_s4 + $0x18] sm:$0xff]   ;;  %v1433_v14 = vld [vmem:[%s1895_s4 + $0x20] sm:$0xff]   ;;  %1407 = vset.pattern.permute.xlu1 %v1552_v49  ;;  %vm806_vm4 = vcmask 64512   ;;  %v1553_v54 = vmov 2   ;;  %v1554_v55 = vmov 6  }
  0x26   : > { %1309 = vmatmul.mubr.msk.bf16.vlgmr.msra.gmra.mrb[0].mxu1 %vm485_vm2, %v476_v4  ;;  %1314 = vmatprep.subr.bf16.mxu0 %v1549_v3  ;;  %v1434_v15 = vld [vmem:[%s1895_s4 + $0x28] sm:$0xff]   ;;  %v1435_v16 = vld [vmem:[%s1895_s4 + $0x30] sm:$0xff]   ;;  %v1262_v17 = vld [vmem:[%s1896_s5] ss:$0 sm:$0xff]  ;;  %v1555_v56 = vmov 3   ;;  %v1556_v57 = vmov 7  }
  0x27   : > { %632 = vmatprep.mubr.bf16.mxu1 %v1551_v8  ;;  %601 = vmatpush1.bf16.msra.mxu1 %v1423_v5  ;;  %v1264_v23 = vld [vmem:[%s1897_s6] ss:$0 sm:$0xff]  ;;  %v1265_v24 = vld [vmem:[%s1897_s6 + $0x1] ss:$0 sm:$0xff]  ;;  %v1266_v25 = vld [vmem:[%s1897_s6 + $0x2] ss:$0 sm:$0xff] }
  0x28   : > { %602 = vmatprep.subr.bf16.mxu1 %v1428_v7  ;;  %v1267_v34 = vld [vmem:[%s1898_s7] ss:$0 sm:$0xff]  ;;  %v1436_v43 = vld [vmem:[%s1895_s4 + $0x38] sm:$0xff]   ;;  %v1557_v58 = vmov 4   ;;  %v1558_v59 = vmov 5   ;;  %s1559_s16 = smov 96  }
  0x29   : > { %1315 = vmatpush3.bf16.msra.mxu0 %v1430_v11  ;;  %vm1057_vm7 = vcmask 1040384   ;;  %vm1059_vm8 = vcmask 1041408   ;;  %vm1061_vm9 = vcmask 1042432   ;;  %vm1063_vm10 = vcmask 1043456   ;;  %s1287_s21 = sshll.u32 %s1539_s20, 7  ;;  %s1155_s30 = sshll.u32 %s347_s25, 4  ;;  %s1841_s30 = int_to_ptr.vmem [resolvable:$true] %s1155_s30 }
  0x2a   : > { %1316 = vmatprep.subr.bf16.mxu0 %v1549_v3  ;;  %vm1065_vm11 = vcmask 1044480   ;;  %vm1067_vm12 = vcmask 1045504   ;;  %vm1069_vm13 = vcmask 1046528   ;;  %s1839_s23 = scalar_lea.hbm %s1902_s11, %s1287_s21  ;;  %s1141_s20 = scalar_lea.sflag [#allocation12], %s345_s12 }
  0x2b   : > { %603 = vmatpush1.bf16.msra.mxu1 %v1426_v9  ;;  %s1465_s24 = scalar_lea.vmem %s1841_s30, 128  ;;  %s1560_s26 = smov [#allocation11]  }
  0x2c   : > { %1332 = vmatprep.subr.bf16.mxu1 %v1549_v3  ;;  %p1466_p12 = scmp.ne.s32.totalorder %s1841_s30, %s1465_s24  ;;  %s1469_s28 = sshll.u32 %s1560_s26, 4  ;;  %s1470_s28 = int_to_ptr.vmem [resolvable:$false] %s1469_s28 }
  0x2d   : > { %1317 = vmatpush3.bf16.msra.mxu0 %v1431_v12  ;;  %s1471_s13 = scalar_lea.vmem %s1470_s28, 256  ;;  %p1472_p1 = scmp.lt.s32.totalorder %s1841_s30, %s1470_s28 }
  0x2e   : > { %1318 = vmatprep.subr.bf16.mxu0 %v1549_v3  ;;  %p1467_p13 = pnand %p1466_p12, %p1661_p4  ;;  %p1473_p2 = scmp.lt.s32.totalorder %s1471_s13, %s1465_s24 }
  0x30   : > { %p1468_p0 = pneg %p1467_p13  ;;  %p1474_p3 = por %p1473_p2, %p1472_p1 }
  0x31   : > { %1319 = vmatpush3.bf16.msra.mxu0 %v1432_v13 }
  0x32   : > { %1320 = vmatprep.subr.bf16.mxu0 %v1549_v3  ;;  %p1475_p5 = pnand %p1474_p3, %p1468_p0 }
  0x35   : > { %1321 = vmatpush3.bf16.msra.mxu0 %v1433_v14 }
  0x36   : > { %1322 = vmatprep.subr.bf16.mxu0 %v1549_v3 }
  0x39   : > { %1323 = vmatpush3.bf16.msra.mxu0 %v1434_v15 }
  0x3a   : > { %1324 = vmatprep.subr.bf16.mxu0 %v1549_v3 }
  0x3d   : > { %1325 = vmatpush3.bf16.msra.mxu0 %v1435_v16 }
  0x3e   : > { %1326 = vmatprep.subr.bf16.mxu0 %v1549_v3 }
  0x41   : > { %1327 = vmatpush3.bf16.msra.mxu0 %v1436_v43 }
  0xf9   : > { %v523_v18 = vpop.f32.mrb[0].mxu1 }
  0xfa   : > { %v1756_v19 = vadd.f32 %v1262_v17, %v523_v18  ;;  %v1310_v20 = vpop.f32.mrb[1].mxu1 }
  0xfb   : > { %v526_v21 = vpop.f32.mrb[2].mxu1  ;;  %v815_v20 = vlaneseq }
  0xfc   : > { %530 = vst.msk [vmem:[#allocation10 + $0x2] sm:$0xff] %vm474_vm0, %v1756_v19  ;;  %v1311_v22 = vpop.f32.mrb[3].mxu1  ;;  %v1283_v60 = vmul.f32 -1.442695, %v1756_v19 }
 0x103   : > { %v554_v26 = vld [vmem:[#allocation10 + $0x8] sm:$0x3]  ;;  %v531_v27 = vld [vmem:[#allocation10] sm:$0xff] }
 0x104   : > { %v538_v28 = vld [vmem:[#allocation10 + $0x1] sm:$0xff]  ;;  %v537_v29 = vmul.f32 %v1264_v23, %v531_v27  ;;  %v809_v27 = vld [vmem:[%s1900_s9] sm:$0xff] }
 0x105   : > { %v544_v30 = vmul.f32 %v1265_v24, %v538_v28  ;;  %v546_v31 = vld [vmem:[#allocation10 + $0x2] sm:$0xff]  ;;  %556 = vst.msk [vmem:[#allocation10] sm:$0x3] %vm455_vm3, %v554_v26  ;;  %v1795_v24 = vshrl.u32 %v815_v20, 7 }
 0x106   : > { %v552_v33 = vmul.f32 %v1266_v25, %v546_v31 }
 0x107   : > { %v545_v32 = vadd.f32 %v544_v30, %v537_v29  ;;  %v849_v25 = vsub.s32 1, %v1795_v24  ;;  %v817_v26 = vsub.s32 0, %v1795_v24  ;;  %v879_v29 = vsub.s32 2, %v1795_v24 }
 0x108   : > { %v969_v43 = vsub.s32 5, %v1795_v24 }
 0x109   : > { %v553_v35 = vadd.f32 %v552_v33, %v545_v32 }
 0x10b   : > { %v564_v36 = vadd.f32 %v1267_v34, %v553_v35  ;;  %v909_v35 = vsub.s32 3, %v1795_v24 }
 0x10d   : > { %v1268_v37 = vmul.f32 -1.442695, %v564_v36 }
 0x10f   : > { %1437 = vpow2.f32 %v1268_v37 }
 0x119   : > { %v1438_v38 = vpop.eup %1437 }
 0x11a   : > { %v568_v39 = vadd.f32 1.0, %v1438_v38  ;;  %v939_v38 = vsub.s32 4, %v1795_v24 }
 0x11c   : > { %1439 = vrcp.f32 %v568_v39 }
 0x11d   : > { %1441 = vpow2.f32 %v1283_v60 }
 0x126   : > { %v1440_v40 = vpop.eup %1439 }
 0x127   : > { %v1773_v41 = vmul.f32 %v1440_v40, %v564_v36  ;;  %v1442_v61 = vpop.eup %1441 }
 0x128   : > { %v1077_v62 = vadd.f32 1.0, %v1442_v61 }
 0x129   : > { %v572_v42 = vpack.c.bf16 %v1773_v41, %v1773_v41 }
 0x12a   : > { %1443 = vrcp.f32 %v1077_v62 }
 0x12b   : > { %1273 = vmatmul.mubr.msk.bf16.vlgmr.msra.gmra.mrb[4].mxu1 %vm474_vm0, %v572_v42 }
 0x12c   : > { %1333 = vmatpush3.bf16.msra.mxu1 %v1693_v1  ;;  %1336 = vmatprep.mubr.msk.bf16.mxu1 %vm1550_vm1, %v1549_v3  ;;  %v1274_v1 = vld [vmem:[%s1899_s8] ss:$0 sm:$0xff] }
 0x12d   : > { %1334 = vmatprep.subr.bf16.mxu1 %v1549_v3 }
 0x130   : > { %1335 = vmatpush3.bf16.msra.mxu1 %v1698_v2 }
 0x134   : > { %v1444_v63 = vpop.eup %1443 }
 0x135   : > { %v1080_v0 = vmul.f32 %v1444_v63, %v1756_v19 }
 0x1fe   : > { %v634_v44 = vpop.f32.mrb[4].mxu1 }
 0x1ff   : > { %v641_v45 = vpack.c.bf16 %v634_v44, %v634_v44  ;;  %v636_v46 = vpop.f32.mrb[5].mxu1 }
 0x200   : > { %774 = vxpose.xlu0.b32.start.end [1/1] (short) (narrow) %v636_v46, 16  ;;  %v638_v47 = vpop.f32.mrb[6].mxu1 }
 0x201   : > { %v639_v48 = vpop.f32.mrb[7].mxu1  ;;  %1329 = vmatmul.mubr.bf16.vlgmr.msra.gmra.mrb[0].mxu0 %v641_v45 }
 0x202   : > { %v999_v48 = vsub.s32 6, %v1795_v24 }
 0x229   : > { %1406 = vset.pattern.permute.xlu0 %v1551_v8 }
 0x280   : > { %v790_v50 = vpop.trf.xlu0 }
 0x281   : > { %807 = vst.msk [vmem:[#allocation7] sm:$0xff] %vm806_vm4, %v790_v50 }
 0x284   : > { %v791_v51 = vpop.trf.xlu0 }
 0x285   : > { %808 = vst.msk [vmem:[#allocation7 + $0x8] sm:$0xff] %vm806_vm4, %v791_v51 }
 0x288   : > { %v813_v52 = vld [vmem:[#allocation7] sm:$0xff] }
 0x289   : > { %856 = vperm.xlu1 %1407, %v813_v52   ;;  %825 = vperm.xlu0 %1406, %v813_v52  }
 0x28c   : > { %v814_v53 = vld [vmem:[#allocation7 + $0x8] sm:$0xff] }
 0x28d   : > { %1408 = vset.pattern.permute.xlu1 %v1553_v54  ;;  %1420 = vset.pattern.permute.xlu0 %v1554_v55 }
 0x28e   : > { %886 = vperm.xlu1 %1408, %v813_v52   ;;  %1016 = vperm.xlu0 %1420, %v814_v53  }
 0x292   : > { %1409 = vset.pattern.permute.xlu1 %v1555_v56  ;;  %1422 = vset.pattern.permute.xlu0 %v1556_v57 }
 0x293   : > { %916 = vperm.xlu1 %1409, %v813_v52  }
 0x297   : > { %1410 = vset.pattern.permute.xlu1 %v1557_v58 }
 0x298   : > { %946 = vperm.xlu1 %1410, %v813_v52  }
 0x29c   : > { %1411 = vset.pattern.permute.xlu1 %v1558_v59 }
 0x29d   : > { %976 = vperm.xlu1 %1411, %v813_v52  }
 0x2a1   : > { %1412 = vset.pattern.permute.xlu1 %v1554_v55 }
 0x2a2   : > { %1006 = vperm.xlu1 %1412, %v813_v52  }
 0x2a6   : > { %1413 = vset.pattern.permute.xlu1 %v1556_v57 }
 0x2a7   : > { %1036 = vperm.xlu1 %1413, %v813_v52  }
 0x2ab   : > { %1414 = vset.pattern.permute.xlu1 %v1551_v8 }
 0x2ac   : > { %836 = vperm.xlu1 %1414, %v814_v53  }
 0x2b0   : > { %1415 = vset.pattern.permute.xlu1 %v1552_v49  ;;  %v810_v49 = vld [vmem:[#allocation9] sm:$0xff] }
 0x2b1   : > { %866 = vperm.xlu1 %1415, %v814_v53  }
 0x2b5   : > { %1416 = vset.pattern.permute.xlu1 %v1553_v54 }
 0x2b6   : > { %896 = vperm.xlu1 %1416, %v814_v53  }
 0x2ba   : > { %1417 = vset.pattern.permute.xlu1 %v1555_v56 }
 0x2bb   : > { %926 = vperm.xlu1 %1417, %v814_v53  }
 0x2bf   : > { %1418 = vset.pattern.permute.xlu1 %v1557_v58 }
 0x2c0   : > { %956 = vperm.xlu1 %1418, %v814_v53  }
 0x2c4   : > { %1419 = vset.pattern.permute.xlu1 %v1558_v59  ;;  %v1029_v59 = vsub.s32 7, %v1795_v24 }
 0x2c5   : > { %986 = vperm.xlu1 %1419, %v814_v53  }
 0x2c9   : > { %1421 = vset.pattern.permute.xlu1 %v1556_v57 }
 0x2ca   : > { %1046 = vperm.xlu1 %1421, %v814_v53  }
 0x2ce   : > { %1082 = vrot.lane.b32.xlu1 %v1080_v0, %s1559_s16 }
 0x2d4   : > { %v747_v2 = vpop.f32.mrb[0].mxu0 }
 0x2d5   : > { %v748_v3 = vadd.f32 %v1274_v1, %v747_v2  ;;  %v1330_v4 = vpop.f32.mrb[1].mxu0 }
 0x2d6   : > { %v750_v5 = vpop.f32.mrb[2].mxu0 }
 0x2d7   : > { %v756_v6 = vand.u32 2147483647, %v748_v3  ;;  %v1331_v7 = vpop.f32.mrb[3].mxu0  ;;  %v753_v18 = vmax.f32 %v748_v3, 0.0  ;;  %vm754_vm6 = vcmp.ne.f32.partialorder %v748_v3, %v748_v3 }
 0x2d9   : > { %v757_v8 = vsub.f32 0.0, %v756_v6 }
 0x2db   : > { %v758_v9 = vmul.f32 1.442695, %v757_v8 }
 0x2dd   : > { %1445 = vpow2.f32 %v758_v9 }
 0x2e7   : > { %v1446_v10 = vpop.eup %1445 }
 0x2e8   : > { %v760_v11 = vadd.f32 1.0, %v1446_v10  ;;  %v763_v12 = vmul.f32 -0.5, %v1446_v10  ;;  %v766_v14 = vand.u32 2147483647, %v1446_v10 }
 0x2ea   : > { %1447 = vlog2.f32 %v760_v11  ;;  %v764_v13 = vadd.f32 1.0, %v763_v12  ;;  %vm767_vm5 = vcmp.lt.f32.partialorder %v766_v14, 0.0004427343 }
 0x2ec   : > { %v765_v17 = vmul.f32 %v1446_v10, %v764_v13 }
 0x2f4   : > { %v1448_v15 = vpop.eup %1447 }
 0x2f5   : > { %v762_v16 = vmul.f32 0.6931472, %v1448_v15 }
 0x2f7   : > { %v768_v19 = vsel %vm767_vm5, %v765_v17, %v762_v16 }
 0x2f8   : > { %v769_v21 = vadd.f32 %v768_v19, %v753_v18 }
 0x2fa   : > { %v770_v22 = vsel %vm754_vm6, %v748_v3, %v769_v21 }
 0x2fb   : > { %771 = vst.msk [vmem:[#allocation5] sm:$0xff] %vm474_vm0, %v770_v22  ;;  %v772_v23 = vmul.f32 %v770_v22, %v1773_v41 }
 0x2fd   : > { %773 = vst.msk [vmem:[#allocation6] sm:$0xff] %vm474_vm0, %v772_v23 }
 0x302   : > { %v811_v28 = vld [vmem:[#allocation5] sm:$0xff] }
 0x303   : > { %v850_v30 = vrot.slane %v811_v28, %v849_v25  ;;  %v818_v31 = vrot.slane %v811_v28, %v817_v26  ;;  %v880_v34 = vrot.slane %v811_v28, %v879_v29  ;;  %v910_v41 = vrot.slane %v811_v28, %v909_v35 }
 0x304   : > { %v940_v46 = vrot.slane %v811_v28, %v939_v38  ;;  %v1807_v47 = vld [vmem:[#allocation6] sm:$0xff]  ;;  %v970_v54 = vrot.slane %v811_v28, %v969_v43  ;;  %v1000_v62 = vrot.slane %v811_v28, %v999_v48  ;;  %v1030_v7 = vrot.slane %v811_v28, %v1029_v59 }
 0x305   : > { %v819_v32 = vmul.f32 %v818_v31, %v809_v27  ;;  %v851_v33 = vmul.f32 %v850_v30, %v809_v27  ;;  %v881_v40 = vmul.f32 %v880_v34, %v809_v27  ;;  %v911_v45 = vmul.f32 %v910_v41, %v809_v27 }
 0x306   : > { %v941_v53 = vmul.f32 %v940_v46, %v809_v27  ;;  %v831_v55 = vrot.slane %v1807_v47, %v817_v26  ;;  %v971_v61 = vmul.f32 %v970_v54, %v809_v27  ;;  %v862_v63 = vrot.slane %v1807_v47, %v849_v25 }
 0x307   : > { %v820_v36 = vmul.f32 1.442695, %v819_v32  ;;  %v852_v39 = vmul.f32 1.442695, %v851_v33  ;;  %v882_v44 = vmul.f32 1.442695, %v881_v40  ;;  %v1001_v6 = vmul.f32 %v1000_v62, %v809_v27 }
 0x308   : > { %v857_v37 = vpop.permute.xlu1 %856  ;;  %v826_v50 = vpop.permute.xlu0 %825  ;;  %v912_v51 = vmul.f32 1.442695, %v911_v45  ;;  %v942_v60 = vmul.f32 1.442695, %v941_v53  ;;  %v972_v5 = vmul.f32 1.442695, %v971_v61  ;;  %v892_v8 = vrot.slane %v1807_v47, %v879_v29 }
 0x309   : > { %1449 = vpow2.f32 %v820_v36  ;;  %v832_v58 = vmul.f32 %v831_v55, %v826_v50  ;;  %v863_v3 = vmul.f32 %v862_v63, %v857_v37  ;;  %v1002_v14 = vmul.f32 1.442695, %v1001_v6 }
 0x30a   : > { %1451 = vpow2.f32 %v852_v39  ;;  %v1031_v15 = vmul.f32 %v1030_v7, %v809_v27  ;;  %v922_v17 = vrot.slane %v1807_v47, %v909_v35  ;;  %v952_v24 = vrot.slane %v1807_v47, %v939_v38 }
 0x30b   : > { %1453 = vpow2.f32 %v882_v44  ;;  %v982_v27 = vrot.slane %v1807_v47, %v969_v43  ;;  %v1012_v35 = vrot.slane %v1807_v47, %v999_v48  ;;  %v1042_v38 = vrot.slane %v1807_v47, %v1029_v59 }
 0x30c   : > { %1455 = vpow2.f32 %v912_v51  ;;  %v1032_v22 = vmul.f32 1.442695, %v1031_v15 }
 0x30d   : > { %v887_v42 = vpop.permute.xlu1 %886  ;;  %1457 = vpow2.f32 %v942_v60  ;;  %v1017_v47 = vpop.permute.xlu0 %1016 }
 0x30e   : > { %v893_v13 = vmul.f32 %v892_v8, %v887_v42  ;;  %1459 = vpow2.f32 %v972_v5 }
 0x30f   : > { %1461 = vpow2.f32 %v1002_v14 }
 0x310   : > { %1463 = vpow2.f32 %v1032_v22 }
 0x312   : > { %v917_v52 = vpop.permute.xlu1 %916 }
 0x313   : > { %v1450_v56 = vpop.eup %1449  ;;  %v923_v20 = vmul.f32 %v922_v17, %v917_v52 }
 0x314   : > { %v822_v57 = vmul.f32 %v1450_v56, %v810_v49  ;;  %v1452_v2 = vpop.eup %1451 }
 0x315   : > { %v1454_v10 = vpop.eup %1453 }
 0x316   : > { %v833_v0 = vadd.f32 %v832_v58, %v822_v57  ;;  %v1456_v18 = vpop.eup %1455 }
 0x317   : > { %v947_v1 = vpop.permute.xlu1 %946  ;;  %v1458_v25 = vpop.eup %1457 }
 0x318   : > { %v854_v4 = vmul.f32 %v1452_v2, %v833_v0  ;;  %v953_v28 = vmul.f32 %v952_v24, %v947_v1  ;;  %v1460_v31 = vpop.eup %1459 }
 0x319   : > { %v1462_v37 = vpop.eup %1461 }
 0x31a   : > { %v864_v9 = vadd.f32 %v863_v3, %v854_v4  ;;  %v1464_v42 = vpop.eup %1463 }
 0x31c   : > { %v977_v11 = vpop.permute.xlu1 %976  ;;  %v884_v12 = vmul.f32 %v1454_v10, %v864_v9 }
 0x31d   : > { %v983_v33 = vmul.f32 %v982_v27, %v977_v11 }
 0x31e   : > { %v894_v16 = vadd.f32 %v893_v13, %v884_v12 }
 0x320   : > { %v914_v19 = vmul.f32 %v1456_v18, %v894_v16 }
 0x321   : > { %v1007_v21 = vpop.permute.xlu1 %1006 }
 0x322   : > { %v924_v23 = vadd.f32 %v923_v20, %v914_v19  ;;  %v1013_v39 = vmul.f32 %v1012_v35, %v1007_v21 }
 0x324   : > { %v944_v26 = vmul.f32 %v1458_v25, %v924_v23 }
 0x326   : > { %v1037_v29 = vpop.permute.xlu1 %1036  ;;  %v954_v30 = vadd.f32 %v953_v28, %v944_v26 }
 0x327   : > { %v1043_v45 = vmul.f32 %v1042_v38, %v1037_v29 }
 0x328   : > { %v974_v32 = vmul.f32 %v1460_v31, %v954_v30 }
 0x32a   : > { %v984_v34 = vadd.f32 %v983_v33, %v974_v32 }
 0x32b   : > { %v837_v36 = vpop.permute.xlu1 %836 }
 0x32c   : > { %v1004_v40 = vmul.f32 %v1462_v37, %v984_v34  ;;  %v839_v43 = vmul.f32 %v837_v36, %v833_v0 }
 0x32e   : > { %v1014_v41 = vadd.f32 %v1013_v39, %v1004_v40  ;;  %v840_v53 = vsel %vm474_vm0, %v839_v43, 0.0 }
 0x32f   : > { %v841_v58 = vrot.slane %v840_v53, 4 }
 0x330   : > { %v867_v44 = vpop.permute.xlu1 %866  ;;  %v1034_v46 = vmul.f32 %v1464_v42, %v1014_v41  ;;  %v1019_v59 = vmul.f32 %v1017_v47, %v1014_v41 }
 0x331   : > { %v869_v49 = vmul.f32 %v867_v44, %v864_v9  ;;  %v842_v1 = vadd.f32 %v841_v58, %v840_v53 }
 0x332   : > { %v1044_v50 = vadd.f32 %v1043_v45, %v1034_v46  ;;  %v1020_v2 = vsel %vm474_vm0, %v1019_v59, 0.0 }
 0x333   : > { %v870_v52 = vsel %vm474_vm0, %v869_v49, 0.0  ;;  %v1021_v7 = vrot.slane %v1020_v2, 4  ;;  %v843_v10 = vrot.slane %v842_v1, 2 }
 0x334   : > { %1072 = vst.msk [vmem:[#allocation9] sm:$0xff] %vm474_vm0, %v1044_v50  ;;  %v871_v55 = vrot.slane %v870_v52, 4 }
 0x335   : > { %v897_v51 = vpop.permute.xlu1 %896  ;;  %v1022_v17 = vadd.f32 %v1021_v7, %v1020_v2  ;;  %v844_v19 = vadd.f32 %v843_v10, %v842_v1 }
 0x336   : > { %v899_v48 = vmul.f32 %v897_v51, %v894_v16  ;;  %v872_v61 = vadd.f32 %v871_v55, %v870_v52 }
 0x337   : > { %v1023_v28 = vrot.slane %v1022_v17, 2  ;;  %v845_v31 = vrot.slane %v844_v19, 1 }
 0x338   : > { %v900_v54 = vsel %vm474_vm0, %v899_v48, 0.0  ;;  %v873_v6 = vrot.slane %v872_v61, 2 }
 0x339   : > { %v901_v56 = vrot.slane %v900_v54, 4  ;;  %v1024_v39 = vadd.f32 %v1023_v28, %v1022_v17  ;;  %v846_v41 = vadd.f32 %v845_v31, %v844_v19 }
 0x33a   : > { %v927_v57 = vpop.permute.xlu1 %926  ;;  %v874_v14 = vadd.f32 %v873_v6, %v872_v61 }
 0x33b   : > { %v929_v60 = vmul.f32 %v927_v57, %v924_v23  ;;  %v902_v63 = vadd.f32 %v901_v56, %v900_v54  ;;  %v1025_v43 = vrot.slane %v1024_v39, 1 }
 0x33c   : > { %v875_v24 = vrot.slane %v874_v14, 1 }
 0x33d   : > { %v930_v62 = vsel %vm474_vm0, %v929_v60, 0.0  ;;  %v903_v8 = vrot.slane %v902_v63, 2  ;;  %v1026_v56 = vadd.f32 %v1025_v43, %v1024_v39 }
 0x33e   : > { %v931_v0 = vrot.slane %v930_v62, 4  ;;  %v876_v36 = vadd.f32 %v875_v24, %v874_v14 }
 0x33f   : > { %v957_v3 = vpop.permute.xlu1 %956  ;;  %v904_v18 = vadd.f32 %v903_v8, %v902_v63 }
 0x340   : > { %v932_v4 = vadd.f32 %v931_v0, %v930_v62  ;;  %v959_v5 = vmul.f32 %v957_v3, %v954_v30  ;;  %v1058_v49 = vsel %vm1057_vm7, %v846_v41, %v876_v36  ;;  %v1284_v0 = vld [vmem:[%s1901_s10] ss:$0 sm:$0xff] }
 0x341   : > { %v905_v29 = vrot.slane %v904_v18, 1 }
 0x342   : > { %v960_v9 = vsel %vm474_vm0, %v959_v5, 0.0  ;;  %v933_v11 = vrot.slane %v932_v4, 2 }
 0x343   : > { %v961_v12 = vrot.slane %v960_v9, 4  ;;  %v906_v40 = vadd.f32 %v905_v29, %v904_v18 }
 0x344   : > { %v987_v13 = vpop.permute.xlu1 %986  ;;  %v934_v20 = vadd.f32 %v933_v11, %v932_v4 }
 0x345   : > { %v962_v15 = vadd.f32 %v961_v12, %v960_v9  ;;  %v989_v16 = vmul.f32 %v987_v13, %v984_v34  ;;  %v1060_v51 = vsel %vm1059_vm8, %v1058_v49, %v906_v40 }
 0x346   : > { %v935_v32 = vrot.slane %v934_v20, 1 }
 0x347   : > { %v963_v21 = vrot.slane %v962_v15, 2  ;;  %v990_v22 = vsel %vm474_vm0, %v989_v16, 0.0 }
 0x348   : > { %v991_v23 = vrot.slane %v990_v22, 4  ;;  %v936_v42 = vadd.f32 %v935_v32, %v934_v20 }
 0x349   : > { %v964_v25 = vadd.f32 %v963_v21, %v962_v15  ;;  %v1047_v26 = vpop.permute.xlu1 %1046 }
 0x34a   : > { %v992_v30 = vadd.f32 %v991_v23, %v990_v22  ;;  %v1049_v27 = vmul.f32 %v1047_v26, %v1044_v50  ;;  %v1062_v48 = vsel %vm1061_vm9, %v1060_v51, %v936_v42 }
 0x34b   : > { %v965_v33 = vrot.slane %v964_v25, 1 }
 0x34c   : > { %v993_v35 = vrot.slane %v992_v30, 2  ;;  %v1050_v34 = vsel %vm474_vm0, %v1049_v27, 0.0 }
 0x34d   : > { %v1051_v37 = vrot.slane %v1050_v34, 4  ;;  %v966_v45 = vadd.f32 %v965_v33, %v964_v25  ;;  %v1083_v60 = vpop.permute.xlu1 %1082 }
 0x34e   : > { %v994_v38 = vadd.f32 %v993_v35, %v992_v30 }
 0x34f   : > { %v1052_v44 = vadd.f32 %v1051_v37, %v1050_v34  ;;  %v1064_v54 = vsel %vm1063_vm10, %v1062_v48, %v966_v45 }
 0x350   : > { %v995_v46 = vrot.slane %v994_v38, 1 }
 0x351   : > { %v1053_v50 = vrot.slane %v1052_v44, 2 }
 0x352   : > { %v996_v52 = vadd.f32 %v995_v46, %v994_v38 }
 0x353   : > { %v1054_v53 = vadd.f32 %v1053_v50, %v1052_v44 }
 0x354   : > { %v1066_v55 = vsel %vm1065_vm11, %v1064_v54, %v996_v52 }
 0x355   : > { %v1055_v47 = vrot.slane %v1054_v53, 1  ;;  %v1068_v58 = vsel %vm1067_vm12, %v1066_v55, %v1026_v56 }
 0x357   : > { %v1056_v57 = vadd.f32 %v1055_v47, %v1054_v53 }
 0x359   : > { %v1070_v59 = vsel %vm1069_vm13, %v1068_v58, %v1056_v57 }
 0x35a   : > { %1071 = vst.msk [vmem:[#allocation8] sm:$0xff] %vm474_vm0, %v1070_v59 }
 0x361   : > { %v1073_v61 = vld [vmem:[#allocation8] sm:$0xff] }
 0x362   : > { %v1085_v62 = vmul.f32 %v1083_v60, %v1073_v61 }
 0x364   : > { %v1086_v63 = vpack.c.bf16 %v1085_v62, %v1085_v62 }
 0x366   : > { %1337 = vmatmul.mubr.msk.bf16.vlgmr.msra.gmra.mrb[8].mxu1 %vm474_vm0, %v1086_v63 }
 0x439   : > { %v1133_v1 = vpop.f32.mrb[8].mxu1 }
 0x43a   : > { %v1134_v2 = vadd.f32 %v1284_v0, %v1133_v1  ;;  %v1338_v3 = vpop.f32.mrb[9].mxu1 }
 0x43b   : > { %v1136_v4 = vpop.f32.mrb[10].mxu1 }
 0x43c   : > { %1139 = vst.msk [vmem:[%s347_s25] sm:$0xff] %vm485_vm2, %v1134_v2  ;;  %v1339_v5 = vpop.f32.mrb[11].mxu1 }
 0x43d   : > { %1478 = shalt.err (!%p1475_p5)
}
 0x43e   : > { %s1479_s25 = scalar_lea.hbm %s1839_s23, 128  ;;  %s1483_s19 = scalar_lea.hbm %s1902_s11, 256 }
 0x43f   : > { %p1480_p6 = scmp.ne.s32.totalorder %s1839_s23, %s1479_s25  ;;  %p1484_p10 = scmp.lt.u32.totalorder %s1839_s23, %s1902_s11 }
 0x440   : > { %p1485_p11 = scmp.lt.u32.totalorder %s1483_s19, %s1479_s25  ;;  %p1487_p13 = scmp.lt.u32.totalorder %s1479_s25, %s1839_s23 }
 0x441   : > { %p1481_p7 = pnand %p1480_p6, %p1661_p4 }
 0x442   : > { %p1486_p12 = por %p1485_p11, %p1484_p10 }
 0x443   : > { %p1482_p9 = pneg %p1481_p7 }
 0x444   : > { %p1488_p0 = por %p1487_p13, %p1486_p12 }
 0x446   : > { %p1489_p1 = pnand %p1488_p0, %p1482_p9 }
 0x448   : > { %1492 = shalt.err (!%p1489_p1)
}
 0x449   : > { %1340 = dma.vmem_to_hbm [thread:$0]  (%p1661_p4), %s1841_s30, 128, %s1839_s23, %s1141_s20  }
 0x44a PF: > { %p1346_p2 = scmp.ge.s32.totalorder %s1547_s22, 2  ;;  %s1167_s16 = sand.u32 1, %s1527_s17  }
 0x44b   : > { %s1168_s24 = scalar_lea.sflag [#allocation12], %s1167_s16 }
 0x44c   : > { %p1343_p3 = pnand %p1346_p2, %p1668_p8 }
 0x44e   : > { %1522 = dma.done.wait (!%p1343_p3), %s1168_s24, 128  }
 0x44f   : > { %1524 = vsyncadd (!%p1343_p3), %s1168_s24, 4294967168  ;;  %s24_s22 = sadd.s32 1, %s1547_s22   ;;  %s1912_s26 = sld [smem:[#allocation18_spill]] }
 0x450   : > { %p21_p5 = scmp.ge.s32.totalorder %s24_s22, 4   ;;  %s1913_s19 = sld [smem:[#allocation21_spill]] }
 0x451   : > { %s1914_s20 = sld [smem:[#allocation19_spill]]  ;;  %s1915_s21 = sld [smem:[#allocation20_spill]] }
 0x452   : > { %s1916_s17 = smov %s1531_s18  ;;  %23 = sbr.rel (!%p21_p5) target bundleno = 4 (0x4), region = 185 }
 0x455   : > { %s1917_s18 = smov %s1912_s26 }
 0x459   :  { %1173 = vsyncpa [#allocation12], 1 }
 0x45a   :  { %1175 = vsyncpa [#allocation12 + $0x1], 1 }
 0x45b   :  { %1176 = vsyncmov [#allocation4] }
 0x45e   :  { %s1177_s27 = vpop.sfrf %1176 }
 0x45f   :  { %p1290_p4 = scmp.ne.s32.totalorder %s1177_s27, 0 }
 0x461   :  { %1181 = shalt.err (%p1290_p4)  }
 0x462   :  { %1183 = vsyncmov [#allocation4 + $0x1] }
 0x465   :  { %s1184_s29 = vpop.sfrf %1183 }
 0x466   :  { %p1291_p8 = scmp.ne.s32.totalorder %s1184_s29, 0 }
 0x468   :  { %1188 = shalt.err (%p1291_p8)  }

</bundles_post_ra>
